<compile_context>
chip_gen: v7x
topology: tpu7x:2x2x1
jax: 0.10.0
libtpu: 0.0.40
codegen_flags: <defaults>
</compile_context>

<pallas_src>
import functools

import jax
import jax.numpy as jnp
from jax.experimental import pallas as pl
from jax.experimental.pallas import tpu as pltpu


# ----------------------------- fused kernel ----------------------------------

def _layernorm(x, gamma, beta, eps):
    mean = jnp.mean(x, axis=-1, keepdims=True)
    var = jnp.mean((x - mean) ** 2, axis=-1, keepdims=True)
    return (x - mean) * jax.lax.rsqrt(var + eps) * gamma + beta


def _gelu(x):
    # TODO(synk): exact erf-GELU (PyTorch default) has no guaranteed Mosaic
    # lowering; tanh approximation used (~1e-3 level drift vs reference).
    return 0.5 * x * (1.0 + jnp.tanh(0.7978845608028654 * (x + 0.044715 * x * x * x)))


def _bert_kernel(x_ref, mask_ref, eg_ref, eb_ref,
                 qkvw_ref, qkvb_ref, ow_ref, ob_ref, l1g_ref, l1b_ref,
                 iw_ref, ib_ref, outw_ref, outb_ref, l2g_ref, l2b_ref,
                 pw_ref, pb_ref, cw_ref, cb_ref,
                 o_ref, ctx_ref,
                 *, num_layers, num_heads, head_dim, eps, scale):
    # x_ref: (S, h) f32 embedding sum for ONE batch element (grid axis = batch)
    # mask_ref: (1, S) f32 additive key-position bias (0 or -10000)
    S, h = x_ref.shape

    x = _layernorm(x_ref[...], eg_ref[...], eb_ref[...], eps)          # (S, h) f32
    bias = mask_ref[...]                                               # (1, S) f32

    for l in range(num_layers):
        # ---- self-attention: fused QKV projection (one MXU matmul) ----------
        qkv = jnp.dot(x.astype(jnp.bfloat16), qkvw_ref[l],
                      preferred_element_type=jnp.float32) + qkvb_ref[l]  # (S, 3h)
        q = qkv[:, 0:h]
        k = qkv[:, h:2 * h]
        v = qkv[:, 2 * h:3 * h]

        for hh in range(num_heads):
            c0 = hh * head_dim
            qh = q[:, c0:c0 + head_dim]                                 # (S, hd)
            kh = k[:, c0:c0 + head_dim]
            vh = v[:, c0:c0 + head_dim]
            # q @ k^T without an explicit transpose (NT dot_general).
            scores = jax.lax.dot_general(
                qh, kh, (((1,), (1,)), ((), ())),
                preferred_element_type=jnp.float32) * scale             # (S, S)
            scores = scores + bias                                      # broadcast over queries
            scores = scores - jnp.max(scores, axis=-1, keepdims=True)
            p = jnp.exp(scores)
            p = p * pl.reciprocal(jnp.sum(p, axis=-1, keepdims=True), approx=True)
            ctx_ref[:, c0:c0 + head_dim] = jnp.dot(
                p, vh, preferred_element_type=jnp.float32)

        ctx = ctx_ref[...]                                              # (S, h) f32
        attn_out = jnp.dot(ctx.astype(jnp.bfloat16), ow_ref[l],
                           preferred_element_type=jnp.float32) + ob_ref[l]
        x = _layernorm(attn_out + x, l1g_ref[l], l1b_ref[l], eps)       # add & norm

        # ---- feed-forward ----------------------------------------------------
        inter = _gelu(jnp.dot(x.astype(jnp.bfloat16), iw_ref[l],
                              preferred_element_type=jnp.float32) + ib_ref[l])
        ffn = jnp.dot(inter.astype(jnp.bfloat16), outw_ref[l],
                      preferred_element_type=jnp.float32) + outb_ref[l]
        x = _layernorm(ffn + x, l2g_ref[l], l2b_ref[l], eps)            # add & norm

    # ---- pooler (CLS token) -> classifier -> softmax, all fused -------------
    cls_tok = x[0:1, :]                                                 # (1, h)
    pooled = jnp.tanh(jnp.dot(cls_tok.astype(jnp.bfloat16), pw_ref[...],
                              preferred_element_type=jnp.float32) + pb_ref[...])
    logits = jnp.dot(pooled.astype(jnp.bfloat16), cw_ref[...],
                     preferred_element_type=jnp.float32) + cb_ref[...]  # (1, nl)
    logits = logits - jnp.max(logits, axis=-1, keepdims=True)
    e = jnp.exp(logits)
    o_ref[...] = e / jnp.sum(e, axis=-1, keepdims=True)                 # exact normalize


# ----------------------------- model wrapper ----------------------------------

CONFIG = dict(
    vocab_size=100,
    hidden=32,
    num_layers=2,
    num_heads=2,
    head_dim=16,
    intermediate=64,
    max_pos=16,
    type_vocab=2,
    num_labels=4,
)


def init_params(key, cfg):
    std = 0.02
    h, inter = cfg["hidden"], cfg["intermediate"]
    nl, L = cfg["num_labels"], cfg["num_layers"]

    def nrm(k, shape, dtype=jnp.bfloat16):
        return (jax.random.normal(k, shape, jnp.float32) * std).astype(dtype)

    keys = iter(jax.random.split(key, 16))
    return {
        # embedding tables stay f32 (gathered in plain JAX)
        "word_emb": nrm(next(keys), (cfg["vocab_size"], h), jnp.float32),
        "pos_emb": nrm(next(keys), (cfg["max_pos"], h), jnp.float32),
        "type_emb": nrm(next(keys), (cfg["type_vocab"], h), jnp.float32),
        "emb_ln_g": jnp.ones((1, h), jnp.float32),
        "emb_ln_b": jnp.zeros((1, h), jnp.float32),
        # per-layer weights stacked along a leading layer axis; matmul weights bf16
        "qkv_w": nrm(next(keys), (L, h, 3 * h)),
        "qkv_b": jnp.zeros((L, 1, 3 * h), jnp.float32),
        "o_w": nrm(next(keys), (L, h, h)),
        "o_b": jnp.zeros((L, 1, h), jnp.float32),
        "ln1_g": jnp.ones((L, 1, h), jnp.float32),
        "ln1_b": jnp.zeros((L, 1, h), jnp.float32),
        "i_w": nrm(next(keys), (L, h, inter)),
        "i_b": jnp.zeros((L, 1, inter), jnp.float32),
        "out_w": nrm(next(keys), (L, inter, h)),
        "out_b": jnp.zeros((L, 1, h), jnp.float32),
        "ln2_g": jnp.ones((L, 1, h), jnp.float32),
        "ln2_b": jnp.zeros((L, 1, h), jnp.float32),
        "pooler_w": nrm(next(keys), (h, h)),
        "pooler_b": jnp.zeros((1, h), jnp.float32),
        "cls_w": nrm(next(keys), (h, nl)),
        "cls_b": jnp.zeros((1, nl), jnp.float32),
    }


def bert_classifier_forward(params, cfg, input_ids, attention_mask, token_type_ids):
    B, S = input_ids.shape
    h, nh, hd = cfg["hidden"], cfg["num_heads"], cfg["head_dim"]
    L, nl = cfg["num_layers"], cfg["num_labels"]
    scale = 1.0 / float(hd) ** 0.5

    # Embeddings (data-dependent gathers: plain-JAX glue).
    emb = (params["word_emb"][input_ids]
           + params["pos_emb"][jnp.arange(S)][None, :, :]
           + params["type_emb"][token_type_ids]).astype(jnp.float32)        # (B, S, h)

    # Additive key-position mask bias, kept compact as (B, 1, S).
    mask_bias = ((1.0 - attention_mask.astype(jnp.float32)) * -10000.0
                 ).reshape(B, 1, S)

    kernel = functools.partial(_bert_kernel, num_layers=L, num_heads=nh,
                               head_dim=hd, eps=1e-12, scale=scale)

    inputs = (emb, mask_bias,
              params["emb_ln_g"], params["emb_ln_b"],
              params["qkv_w"], params["qkv_b"],
              params["o_w"], params["o_b"],
              params["ln1_g"], params["ln1_b"],
              params["i_w"], params["i_b"],
              params["out_w"], params["out_b"],
              params["ln2_g"], params["ln2_b"],
              params["pooler_w"], params["pooler_b"],
              params["cls_w"], params["cls_b"])

    def _full_spec(a):
        return pl.BlockSpec(a.shape, lambda b: (0,) * a.ndim)

    in_specs = [pl.BlockSpec((None, S, h), lambda b: (b, 0, 0)),   # per-batch activations
                pl.BlockSpec((None, 1, S), lambda b: (b, 0, 0))]   # per-batch mask bias
    in_specs += [_full_spec(a) for a in inputs[2:]]                # shared weights

    probs = pl.pallas_call(
        kernel,
        out_shape=jax.ShapeDtypeStruct((B, 1, nl), jnp.float32),
        grid=(B,),
        in_specs=in_specs,
        out_specs=pl.BlockSpec((None, 1, nl), lambda b: (b, 0, 0)),
        scratch_shapes=[pltpu.VMEM((S, h), jnp.float32)],          # per-head context assembly
        compiler_params=pltpu.CompilerParams(
            dimension_semantics=("parallel",)),                    # batch sharded on v7x 2 TCs
    )(*inputs)
    return probs.reshape(B, nl)


# ----------------------------------- main --------------------------------------

if __name__ == "__main__":
    cfg = CONFIG
    key = jax.random.PRNGKey(0)
    pkey, ikey, tkey = jax.random.split(key, 3)

    params = init_params(pkey, cfg)

    B, S = 2, 8
    input_ids = jax.random.randint(ikey, (B, S), 0, cfg["vocab_size"], dtype=jnp.int32)
    token_type_ids = jax.random.randint(tkey, (B, S), 0, cfg["type_vocab"], dtype=jnp.int32)
    # Mask out the last two tokens of the second example.
    attention_mask = jnp.ones((B, S), jnp.int32).at[1, 6:].set(0)

    fwd = jax.jit(lambda p, i, m, t: bert_classifier_forward(p, cfg, i, m, t))
    probs = jax.block_until_ready(fwd(params, input_ids, attention_mask, token_type_ids))

    assert probs.shape == (B, cfg["num_labels"])
    assert bool(jnp.all(jnp.isfinite(probs)))
    assert bool(jnp.allclose(jnp.sum(probs, axis=1), 1.0, atol=1e-4))
    print("KERNEL_OK")
</pallas_src>

<mosaic_0001>
module attributes {stable_mosaic.version = 11 : i64} {
  func.func @_bert_kernel(%arg0: i32, %arg1: memref<1x8x32xf32, #tpu.memory_space<vmem>>, %arg2: memref<1x1x8xf32, #tpu.memory_space<vmem>>, %arg3: memref<1x32xf32, #tpu.memory_space<vmem>>, %arg4: memref<1x32xf32, #tpu.memory_space<vmem>>, %arg5: memref<2x32x96xbf16, #tpu.memory_space<vmem>>, %arg6: memref<2x1x96xf32, #tpu.memory_space<vmem>>, %arg7: memref<2x32x32xbf16, #tpu.memory_space<vmem>>, %arg8: memref<2x1x32xf32, #tpu.memory_space<vmem>>, %arg9: memref<2x1x32xf32, #tpu.memory_space<vmem>>, %arg10: memref<2x1x32xf32, #tpu.memory_space<vmem>>, %arg11: memref<2x32x64xbf16, #tpu.memory_space<vmem>>, %arg12: memref<2x1x64xf32, #tpu.memory_space<vmem>>, %arg13: memref<2x64x32xbf16, #tpu.memory_space<vmem>>, %arg14: memref<2x1x32xf32, #tpu.memory_space<vmem>>, %arg15: memref<2x1x32xf32, #tpu.memory_space<vmem>>, %arg16: memref<2x1x32xf32, #tpu.memory_space<vmem>>, %arg17: memref<32x32xbf16, #tpu.memory_space<vmem>>, %arg18: memref<1x32xf32, #tpu.memory_space<vmem>>, %arg19: memref<32x4xbf16, #tpu.memory_space<vmem>>, %arg20: memref<1x4xf32, #tpu.memory_space<vmem>>, %arg21: memref<1x1x4xf32, #tpu.memory_space<vmem>>, %arg22: memref<8x32xf32, #tpu.memory_space<vmem>>) attributes {dimension_semantics = [#tpu.dimension_semantics<parallel>], iteration_bounds = array<i64: 2>, scalar_prefetch = 0 : i64, scratch_operands = 1 : i64, tpu.core_type = #tpu.core_type<tc>, window_params = [{transform_indices = @transform_0, window_bounds = array<i64: 1, 8, 32>}, {transform_indices = @transform_1, window_bounds = array<i64: 1, 1, 8>}, {pipeline_mode = #tpu.pipeline_mode<synchronous>, transform_indices = @transform_2, window_bounds = array<i64: 1, 32>}, {pipeline_mode = #tpu.pipeline_mode<synchronous>, transform_indices = @transform_3, window_bounds = array<i64: 1, 32>}, {pipeline_mode = #tpu.pipeline_mode<synchronous>, transform_indices = @transform_4, window_bounds = array<i64: 2, 32, 96>}, {pipeline_mode = #tpu.pipeline_mode<synchronous>, transform_indices = @transform_5, window_bounds = array<i64: 2, 1, 96>}, {pipeline_mode = #tpu.pipeline_mode<synchronous>, transform_indices = @transform_6, window_bounds = array<i64: 2, 32, 32>}, {pipeline_mode = #tpu.pipeline_mode<synchronous>, transform_indices = @transform_7, window_bounds = array<i64: 2, 1, 32>}, {pipeline_mode = #tpu.pipeline_mode<synchronous>, transform_indices = @transform_8, window_bounds = array<i64: 2, 1, 32>}, {pipeline_mode = #tpu.pipeline_mode<synchronous>, transform_indices = @transform_9, window_bounds = array<i64: 2, 1, 32>}, {pipeline_mode = #tpu.pipeline_mode<synchronous>, transform_indices = @transform_10, window_bounds = array<i64: 2, 32, 64>}, {pipeline_mode = #tpu.pipeline_mode<synchronous>, transform_indices = @transform_11, window_bounds = array<i64: 2, 1, 64>}, {pipeline_mode = #tpu.pipeline_mode<synchronous>, transform_indices = @transform_12, window_bounds = array<i64: 2, 64, 32>}, {pipeline_mode = #tpu.pipeline_mode<synchronous>, transform_indices = @transform_13, window_bounds = array<i64: 2, 1, 32>}, {pipeline_mode = #tpu.pipeline_mode<synchronous>, transform_indices = @transform_14, window_bounds = array<i64: 2, 1, 32>}, {pipeline_mode = #tpu.pipeline_mode<synchronous>, transform_indices = @transform_15, window_bounds = array<i64: 2, 1, 32>}, {pipeline_mode = #tpu.pipeline_mode<synchronous>, transform_indices = @transform_16, window_bounds = array<i64: 32, 32>}, {pipeline_mode = #tpu.pipeline_mode<synchronous>, transform_indices = @transform_17, window_bounds = array<i64: 1, 32>}, {pipeline_mode = #tpu.pipeline_mode<synchronous>, transform_indices = @transform_18, window_bounds = array<i64: 32, 4>}, {pipeline_mode = #tpu.pipeline_mode<synchronous>, transform_indices = @transform_19, window_bounds = array<i64: 1, 4>}, {transform_indices = @transform_20, window_bounds = array<i64: 1, 1, 4>}]} {
    %c0 = arith.constant 0 : index
    %c0_0 = arith.constant 0 : index
    %c0_1 = arith.constant 0 : index
    %0 = vector.load %arg1[%c0, %c0_0, %c0_1] : memref<1x8x32xf32, #tpu.memory_space<vmem>>, vector<1x8x32xf32>
    %1 = vector.shape_cast %0 : vector<1x8x32xf32> to vector<8x32xf32>
    %c0_2 = arith.constant 0 : index
    %c0_3 = arith.constant 0 : index
    %2 = vector.load %arg3[%c0_2, %c0_3] : memref<1x32xf32, #tpu.memory_space<vmem>>, vector<1x32xf32>
    %c0_4 = arith.constant 0 : index
    %c0_5 = arith.constant 0 : index
    %3 = vector.load %arg4[%c0_4, %c0_5] : memref<1x32xf32, #tpu.memory_space<vmem>>, vector<1x32xf32>
    %cst = arith.constant dense<0.000000e+00> : vector<8xf32>
    %4 = vector.multi_reduction <add>, %1, %cst [1] : vector<8x32xf32> to vector<8xf32>
    %5 = vector.shape_cast %4 : vector<8xf32> to vector<8x1xf32>
    %cst_6 = arith.constant 3.200000e+01 : f32
    %6 = vector.broadcast %cst_6 : f32 to vector<8x1xf32>
    %7 = arith.divf %5, %6 : vector<8x1xf32>
    %8 = vector.broadcast %7 : vector<8x1xf32> to vector<8x32xf32>
    %9 = arith.subf %1, %8 : vector<8x32xf32>
    %10 = arith.mulf %9, %9 : vector<8x32xf32>
    %cst_7 = arith.constant dense<0.000000e+00> : vector<8xf32>
    %11 = vector.multi_reduction <add>, %10, %cst_7 [1] : vector<8x32xf32> to vector<8xf32>
    %12 = vector.shape_cast %11 : vector<8xf32> to vector<8x1xf32>
    %cst_8 = arith.constant 3.200000e+01 : f32
    %13 = vector.broadcast %cst_8 : f32 to vector<8x1xf32>
    %14 = arith.divf %12, %13 : vector<8x1xf32>
    %15 = vector.broadcast %7 : vector<8x1xf32> to vector<8x32xf32>
    %16 = arith.subf %1, %15 : vector<8x32xf32>
    %cst_9 = arith.constant 9.99999996E-13 : f32
    %17 = vector.broadcast %cst_9 : f32 to vector<8x1xf32>
    %18 = arith.addf %14, %17 : vector<8x1xf32>
    %19 = math.rsqrt %18 : vector<8x1xf32>
    %20 = vector.broadcast %19 : vector<8x1xf32> to vector<8x32xf32>
    %21 = arith.mulf %16, %20 : vector<8x32xf32>
    %22 = vector.broadcast %2 : vector<1x32xf32> to vector<8x32xf32>
    %23 = arith.mulf %21, %22 : vector<8x32xf32>
    %24 = vector.broadcast %3 : vector<1x32xf32> to vector<8x32xf32>
    %25 = arith.addf %23, %24 : vector<8x32xf32>
    %c0_10 = arith.constant 0 : index
    %c0_11 = arith.constant 0 : index
    %c0_12 = arith.constant 0 : index
    %26 = vector.load %arg2[%c0_10, %c0_11, %c0_12] : memref<1x1x8xf32, #tpu.memory_space<vmem>>, vector<1x1x8xf32>
    %27 = vector.shape_cast %26 : vector<1x1x8xf32> to vector<1x8xf32>
    %28 = arith.truncf %25 : vector<8x32xf32> to vector<8x32xbf16>
    %c0_13 = arith.constant 0 : index
    %c0_14 = arith.constant 0 : index
    %c0_15 = arith.constant 0 : index
    %29 = vector.load %arg5[%c0_13, %c0_14, %c0_15] : memref<2x32x96xbf16, #tpu.memory_space<vmem>>, vector<1x32x96xbf16>
    %30 = vector.shape_cast %29 : vector<1x32x96xbf16> to vector<32x96xbf16>
    %cst_16 = arith.constant dense<0.000000e+00> : vector<8x96xf32>
    %31 = tpu.matmul %28, %30, %cst_16 {dimension_numbers = #tpu.dot_dimension_numbers<[1], [0], [0], [1], [0, 0, 1, 1], [], []>} : vector<8x32xbf16>, vector<32x96xbf16>, vector<8x96xf32> -> vector<8x96xf32>
    %c0_17 = arith.constant 0 : index
    %c0_18 = arith.constant 0 : index
    %c0_19 = arith.constant 0 : index
    %32 = vector.load %arg6[%c0_17, %c0_18, %c0_19] : memref<2x1x96xf32, #tpu.memory_space<vmem>>, vector<1x1x96xf32>
    %33 = vector.shape_cast %32 : vector<1x1x96xf32> to vector<1x96xf32>
    %34 = vector.broadcast %33 : vector<1x96xf32> to vector<8x96xf32>
    %35 = arith.addf %31, %34 : vector<8x96xf32>
    %36 = vector.extract_strided_slice %35 {offsets = [0, 0], sizes = [8, 32], strides = [1, 1]} : vector<8x96xf32> to vector<8x32xf32>
    %37 = vector.extract_strided_slice %35 {offsets = [0, 32], sizes = [8, 32], strides = [1, 1]} : vector<8x96xf32> to vector<8x32xf32>
    %38 = vector.extract_strided_slice %35 {offsets = [0, 64], sizes = [8, 32], strides = [1, 1]} : vector<8x96xf32> to vector<8x32xf32>
    %39 = vector.extract_strided_slice %36 {offsets = [0, 0], sizes = [8, 16], strides = [1, 1]} : vector<8x32xf32> to vector<8x16xf32>
    %40 = vector.extract_strided_slice %37 {offsets = [0, 0], sizes = [8, 16], strides = [1, 1]} : vector<8x32xf32> to vector<8x16xf32>
    %41 = vector.extract_strided_slice %38 {offsets = [0, 0], sizes = [8, 16], strides = [1, 1]} : vector<8x32xf32> to vector<8x16xf32>
    %cst_20 = arith.constant dense<0.000000e+00> : vector<8x8xf32>
    %42 = tpu.matmul %39, %40, %cst_20 {dimension_numbers = #tpu.dot_dimension_numbers<[1], [1], [0], [0], [0, 0, 1, 0], [], []>} : vector<8x16xf32>, vector<8x16xf32>, vector<8x8xf32> -> vector<8x8xf32>
    %cst_21 = arith.constant 2.500000e-01 : f32
    %43 = vector.broadcast %cst_21 : f32 to vector<8x8xf32>
    %44 = arith.mulf %42, %43 : vector<8x8xf32>
    %45 = vector.broadcast %27 : vector<1x8xf32> to vector<8x8xf32>
    %46 = arith.addf %44, %45 : vector<8x8xf32>
    %cst_22 = arith.constant dense<0xFF800000> : vector<8xf32>
    %47 = vector.multi_reduction <maximumf>, %46, %cst_22 [1] : vector<8x8xf32> to vector<8xf32>
    %48 = vector.shape_cast %47 : vector<8xf32> to vector<8x1xf32>
    %49 = vector.broadcast %48 : vector<8x1xf32> to vector<8x8xf32>
    %50 = arith.subf %46, %49 : vector<8x8xf32>
    %51 = math.exp %50 : vector<8x8xf32>
    %cst_23 = arith.constant dense<0.000000e+00> : vector<8xf32>
    %52 = vector.multi_reduction <add>, %51, %cst_23 [1] : vector<8x8xf32> to vector<8xf32>
    %53 = vector.shape_cast %52 : vector<8xf32> to vector<8x1xf32>
    %54 = tpu.reciprocal %53 {approx = true} : vector<8x1xf32> -> vector<8x1xf32>
    %55 = vector.broadcast %54 : vector<8x1xf32> to vector<8x8xf32>
    %56 = arith.mulf %51, %55 : vector<8x8xf32>
    %cst_24 = arith.constant dense<0.000000e+00> : vector<8x16xf32>
    %57 = tpu.matmul %56, %41, %cst_24 {dimension_numbers = #tpu.dot_dimension_numbers<[1], [0], [0], [1], [0, 0, 1, 1], [], []>} : vector<8x8xf32>, vector<8x16xf32>, vector<8x16xf32> -> vector<8x16xf32>
    %c0_25 = arith.constant 0 : index
    %c0_26 = arith.constant 0 : index
    %58 = vector.load %arg22[%c0_25, %c0_26] : memref<8x32xf32, #tpu.memory_space<vmem>>, vector<8x16xf32>
    tpu.vector_store %arg22[%c0_25, %c0_26], %57 {strides = array<i32>} : memref<8x32xf32, #tpu.memory_space<vmem>>, vector<8x16xf32>,
    %59 = vector.extract_strided_slice %36 {offsets = [0, 16], sizes = [8, 16], strides = [1, 1]} : vector<8x32xf32> to vector<8x16xf32>
    %60 = vector.extract_strided_slice %37 {offsets = [0, 16], sizes = [8, 16], strides = [1, 1]} : vector<8x32xf32> to vector<8x16xf32>
    %61 = vector.extract_strided_slice %38 {offsets = [0, 16], sizes = [8, 16], strides = [1, 1]} : vector<8x32xf32> to vector<8x16xf32>
    %cst_27 = arith.constant dense<0.000000e+00> : vector<8x8xf32>
    %62 = tpu.matmul %59, %60, %cst_27 {dimension_numbers = #tpu.dot_dimension_numbers<[1], [1], [0], [0], [0, 0, 1, 0], [], []>} : vector<8x16xf32>, vector<8x16xf32>, vector<8x8xf32> -> vector<8x8xf32>
    %cst_28 = arith.constant 2.500000e-01 : f32
    %63 = vector.broadcast %cst_28 : f32 to vector<8x8xf32>
    %64 = arith.mulf %62, %63 : vector<8x8xf32>
    %65 = vector.broadcast %27 : vector<1x8xf32> to vector<8x8xf32>
    %66 = arith.addf %64, %65 : vector<8x8xf32>
    %cst_29 = arith.constant dense<0xFF800000> : vector<8xf32>
    %67 = vector.multi_reduction <maximumf>, %66, %cst_29 [1] : vector<8x8xf32> to vector<8xf32>
    %68 = vector.shape_cast %67 : vector<8xf32> to vector<8x1xf32>
    %69 = vector.broadcast %68 : vector<8x1xf32> to vector<8x8xf32>
    %70 = arith.subf %66, %69 : vector<8x8xf32>
    %71 = math.exp %70 : vector<8x8xf32>
    %cst_30 = arith.constant dense<0.000000e+00> : vector<8xf32>
    %72 = vector.multi_reduction <add>, %71, %cst_30 [1] : vector<8x8xf32> to vector<8xf32>
    %73 = vector.shape_cast %72 : vector<8xf32> to vector<8x1xf32>
    %74 = tpu.reciprocal %73 {approx = true} : vector<8x1xf32> -> vector<8x1xf32>
    %75 = vector.broadcast %74 : vector<8x1xf32> to vector<8x8xf32>
    %76 = arith.mulf %71, %75 : vector<8x8xf32>
    %cst_31 = arith.constant dense<0.000000e+00> : vector<8x16xf32>
    %77 = tpu.matmul %76, %61, %cst_31 {dimension_numbers = #tpu.dot_dimension_numbers<[1], [0], [0], [1], [0, 0, 1, 1], [], []>} : vector<8x8xf32>, vector<8x16xf32>, vector<8x16xf32> -> vector<8x16xf32>
    %c0_32 = arith.constant 0 : index
    %c16 = arith.constant 16 : index
    %78 = vector.load %arg22[%c0_32, %c16] : memref<8x32xf32, #tpu.memory_space<vmem>>, vector<8x16xf32>
    tpu.vector_store %arg22[%c0_32, %c16], %77 {strides = array<i32>} : memref<8x32xf32, #tpu.memory_space<vmem>>, vector<8x16xf32>,
    %c0_33 = arith.constant 0 : index
    %c0_34 = arith.constant 0 : index
    %79 = vector.load %arg22[%c0_33, %c0_34] : memref<8x32xf32, #tpu.memory_space<vmem>>, vector<8x32xf32>
    %80 = arith.truncf %79 : vector<8x32xf32> to vector<8x32xbf16>
    %c0_35 = arith.constant 0 : index
    %c0_36 = arith.constant 0 : index
    %c0_37 = arith.constant 0 : index
    %81 = vector.load %arg7[%c0_35, %c0_36, %c0_37] : memref<2x32x32xbf16, #tpu.memory_space<vmem>>, vector<1x32x32xbf16>
    %82 = vector.shape_cast %81 : vector<1x32x32xbf16> to vector<32x32xbf16>
    %cst_38 = arith.constant dense<0.000000e+00> : vector<8x32xf32>
    %83 = tpu.matmul %80, %82, %cst_38 {dimension_numbers = #tpu.dot_dimension_numbers<[1], [0], [0], [1], [0, 0, 1, 1], [], []>} : vector<8x32xbf16>, vector<32x32xbf16>, vector<8x32xf32> -> vector<8x32xf32>
    %c0_39 = arith.constant 0 : index
    %c0_40 = arith.constant 0 : index
    %c0_41 = arith.constant 0 : index
    %84 = vector.load %arg8[%c0_39, %c0_40, %c0_41] : memref<2x1x32xf32, #tpu.memory_space<vmem>>, vector<1x1x32xf32>
    %85 = vector.shape_cast %84 : vector<1x1x32xf32> to vector<1x32xf32>
    %86 = vector.broadcast %85 : vector<1x32xf32> to vector<8x32xf32>
    %87 = arith.addf %83, %86 : vector<8x32xf32>
    %88 = arith.addf %87, %25 : vector<8x32xf32>
    %c0_42 = arith.constant 0 : index
    %c0_43 = arith.constant 0 : index
    %c0_44 = arith.constant 0 : index
    %89 = vector.load %arg9[%c0_42, %c0_43, %c0_44] : memref<2x1x32xf32, #tpu.memory_space<vmem>>, vector<1x1x32xf32>
    %90 = vector.shape_cast %89 : vector<1x1x32xf32> to vector<1x32xf32>
    %c0_45 = arith.constant 0 : index
    %c0_46 = arith.constant 0 : index
    %c0_47 = arith.constant 0 : index
    %91 = vector.load %arg10[%c0_45, %c0_46, %c0_47] : memref<2x1x32xf32, #tpu.memory_space<vmem>>, vector<1x1x32xf32>
    %92 = vector.shape_cast %91 : vector<1x1x32xf32> to vector<1x32xf32>
    %cst_48 = arith.constant dense<0.000000e+00> : vector<8xf32>
    %93 = vector.multi_reduction <add>, %88, %cst_48 [1] : vector<8x32xf32> to vector<8xf32>
    %94 = vector.shape_cast %93 : vector<8xf32> to vector<8x1xf32>
    %cst_49 = arith.constant 3.200000e+01 : f32
    %95 = vector.broadcast %cst_49 : f32 to vector<8x1xf32>
    %96 = arith.divf %94, %95 : vector<8x1xf32>
    %97 = vector.broadcast %96 : vector<8x1xf32> to vector<8x32xf32>
    %98 = arith.subf %88, %97 : vector<8x32xf32>
    %99 = arith.mulf %98, %98 : vector<8x32xf32>
    %cst_50 = arith.constant dense<0.000000e+00> : vector<8xf32>
    %100 = vector.multi_reduction <add>, %99, %cst_50 [1] : vector<8x32xf32> to vector<8xf32>
    %101 = vector.shape_cast %100 : vector<8xf32> to vector<8x1xf32>
    %cst_51 = arith.constant 3.200000e+01 : f32
    %102 = vector.broadcast %cst_51 : f32 to vector<8x1xf32>
    %103 = arith.divf %101, %102 : vector<8x1xf32>
    %104 = vector.broadcast %96 : vector<8x1xf32> to vector<8x32xf32>
    %105 = arith.subf %88, %104 : vector<8x32xf32>
    %cst_52 = arith.constant 9.99999996E-13 : f32
    %106 = vector.broadcast %cst_52 : f32 to vector<8x1xf32>
    %107 = arith.addf %103, %106 : vector<8x1xf32>
    %108 = math.rsqrt %107 : vector<8x1xf32>
    %109 = vector.broadcast %108 : vector<8x1xf32> to vector<8x32xf32>
    %110 = arith.mulf %105, %109 : vector<8x32xf32>
    %111 = vector.broadcast %90 : vector<1x32xf32> to vector<8x32xf32>
    %112 = arith.mulf %110, %111 : vector<8x32xf32>
    %113 = vector.broadcast %92 : vector<1x32xf32> to vector<8x32xf32>
    %114 = arith.addf %112, %113 : vector<8x32xf32>
    %115 = arith.truncf %114 : vector<8x32xf32> to vector<8x32xbf16>
    %c0_53 = arith.constant 0 : index
    %c0_54 = arith.constant 0 : index
    %c0_55 = arith.constant 0 : index
    %116 = vector.load %arg11[%c0_53, %c0_54, %c0_55] : memref<2x32x64xbf16, #tpu.memory_space<vmem>>, vector<1x32x64xbf16>
    %117 = vector.shape_cast %116 : vector<1x32x64xbf16> to vector<32x64xbf16>
    %cst_56 = arith.constant dense<0.000000e+00> : vector<8x64xf32>
    %118 = tpu.matmul %115, %117, %cst_56 {dimension_numbers = #tpu.dot_dimension_numbers<[1], [0], [0], [1], [0, 0, 1, 1], [], []>} : vector<8x32xbf16>, vector<32x64xbf16>, vector<8x64xf32> -> vector<8x64xf32>
    %c0_57 = arith.constant 0 : index
    %c0_58 = arith.constant 0 : index
    %c0_59 = arith.constant 0 : index
    %119 = vector.load %arg12[%c0_57, %c0_58, %c0_59] : memref<2x1x64xf32, #tpu.memory_space<vmem>>, vector<1x1x64xf32>
    %120 = vector.shape_cast %119 : vector<1x1x64xf32> to vector<1x64xf32>
    %121 = vector.broadcast %120 : vector<1x64xf32> to vector<8x64xf32>
    %122 = arith.addf %118, %121 : vector<8x64xf32>
    %cst_60 = arith.constant 5.000000e-01 : f32
    %123 = vector.broadcast %cst_60 : f32 to vector<8x64xf32>
    %124 = arith.mulf %123, %122 : vector<8x64xf32>
    %cst_61 = arith.constant 4.471500e-02 : f32
    %125 = vector.broadcast %cst_61 : f32 to vector<8x64xf32>
    %126 = arith.mulf %125, %122 : vector<8x64xf32>
    %127 = arith.mulf %126, %122 : vector<8x64xf32>
    %128 = arith.mulf %127, %122 : vector<8x64xf32>
    %129 = arith.addf %122, %128 : vector<8x64xf32>
    %cst_62 = arith.constant 0.797884583 : f32
    %130 = vector.broadcast %cst_62 : f32 to vector<8x64xf32>
    %131 = arith.mulf %130, %129 : vector<8x64xf32>
    %132 = math.tanh %131 : vector<8x64xf32>
    %cst_63 = arith.constant 1.000000e+00 : f32
    %133 = vector.broadcast %cst_63 : f32 to vector<8x64xf32>
    %134 = arith.addf %133, %132 : vector<8x64xf32>
    %135 = arith.mulf %124, %134 : vector<8x64xf32>
    %136 = arith.truncf %135 : vector<8x64xf32> to vector<8x64xbf16>
    %c0_64 = arith.constant 0 : index
    %c0_65 = arith.constant 0 : index
    %c0_66 = arith.constant 0 : index
    %137 = vector.load %arg13[%c0_64, %c0_65, %c0_66] : memref<2x64x32xbf16, #tpu.memory_space<vmem>>, vector<1x64x32xbf16>
    %138 = vector.shape_cast %137 : vector<1x64x32xbf16> to vector<64x32xbf16>
    %cst_67 = arith.constant dense<0.000000e+00> : vector<8x32xf32>
    %139 = tpu.matmul %136, %138, %cst_67 {dimension_numbers = #tpu.dot_dimension_numbers<[1], [0], [0], [1], [0, 0, 1, 1], [], []>} : vector<8x64xbf16>, vector<64x32xbf16>, vector<8x32xf32> -> vector<8x32xf32>
    %c0_68 = arith.constant 0 : index
    %c0_69 = arith.constant 0 : index
    %c0_70 = arith.constant 0 : index
    %140 = vector.load %arg14[%c0_68, %c0_69, %c0_70] : memref<2x1x32xf32, #tpu.memory_space<vmem>>, vector<1x1x32xf32>
    %141 = vector.shape_cast %140 : vector<1x1x32xf32> to vector<1x32xf32>
    %142 = vector.broadcast %141 : vector<1x32xf32> to vector<8x32xf32>
    %143 = arith.addf %139, %142 : vector<8x32xf32>
    %144 = arith.addf %143, %114 : vector<8x32xf32>
    %c0_71 = arith.constant 0 : index
    %c0_72 = arith.constant 0 : index
    %c0_73 = arith.constant 0 : index
    %145 = vector.load %arg15[%c0_71, %c0_72, %c0_73] : memref<2x1x32xf32, #tpu.memory_space<vmem>>, vector<1x1x32xf32>
    %146 = vector.shape_cast %145 : vector<1x1x32xf32> to vector<1x32xf32>
    %c0_74 = arith.constant 0 : index
    %c0_75 = arith.constant 0 : index
    %c0_76 = arith.constant 0 : index
    %147 = vector.load %arg16[%c0_74, %c0_75, %c0_76] : memref<2x1x32xf32, #tpu.memory_space<vmem>>, vector<1x1x32xf32>
    %148 = vector.shape_cast %147 : vector<1x1x32xf32> to vector<1x32xf32>
    %cst_77 = arith.constant dense<0.000000e+00> : vector<8xf32>
    %149 = vector.multi_reduction <add>, %144, %cst_77 [1] : vector<8x32xf32> to vector<8xf32>
    %150 = vector.shape_cast %149 : vector<8xf32> to vector<8x1xf32>
    %cst_78 = arith.constant 3.200000e+01 : f32
    %151 = vector.broadcast %cst_78 : f32 to vector<8x1xf32>
    %152 = arith.divf %150, %151 : vector<8x1xf32>
    %153 = vector.broadcast %152 : vector<8x1xf32> to vector<8x32xf32>
    %154 = arith.subf %144, %153 : vector<8x32xf32>
    %155 = arith.mulf %154, %154 : vector<8x32xf32>
    %cst_79 = arith.constant dense<0.000000e+00> : vector<8xf32>
    %156 = vector.multi_reduction <add>, %155, %cst_79 [1] : vector<8x32xf32> to vector<8xf32>
    %157 = vector.shape_cast %156 : vector<8xf32> to vector<8x1xf32>
    %cst_80 = arith.constant 3.200000e+01 : f32
    %158 = vector.broadcast %cst_80 : f32 to vector<8x1xf32>
    %159 = arith.divf %157, %158 : vector<8x1xf32>
    %160 = vector.broadcast %152 : vector<8x1xf32> to vector<8x32xf32>
    %161 = arith.subf %144, %160 : vector<8x32xf32>
    %cst_81 = arith.constant 9.99999996E-13 : f32
    %162 = vector.broadcast %cst_81 : f32 to vector<8x1xf32>
    %163 = arith.addf %159, %162 : vector<8x1xf32>
    %164 = math.rsqrt %163 : vector<8x1xf32>
    %165 = vector.broadcast %164 : vector<8x1xf32> to vector<8x32xf32>
    %166 = arith.mulf %161, %165 : vector<8x32xf32>
    %167 = vector.broadcast %146 : vector<1x32xf32> to vector<8x32xf32>
    %168 = arith.mulf %166, %167 : vector<8x32xf32>
    %169 = vector.broadcast %148 : vector<1x32xf32> to vector<8x32xf32>
    %170 = arith.addf %168, %169 : vector<8x32xf32>
    %171 = arith.truncf %170 : vector<8x32xf32> to vector<8x32xbf16>
    %c1 = arith.constant 1 : index
    %c0_82 = arith.constant 0 : index
    %c0_83 = arith.constant 0 : index
    %172 = vector.load %arg5[%c1, %c0_82, %c0_83] : memref<2x32x96xbf16, #tpu.memory_space<vmem>>, vector<1x32x96xbf16>
    %173 = vector.shape_cast %172 : vector<1x32x96xbf16> to vector<32x96xbf16>
    %cst_84 = arith.constant dense<0.000000e+00> : vector<8x96xf32>
    %174 = tpu.matmul %171, %173, %cst_84 {dimension_numbers = #tpu.dot_dimension_numbers<[1], [0], [0], [1], [0, 0, 1, 1], [], []>} : vector<8x32xbf16>, vector<32x96xbf16>, vector<8x96xf32> -> vector<8x96xf32>
    %c1_85 = arith.constant 1 : index
    %c0_86 = arith.constant 0 : index
    %c0_87 = arith.constant 0 : index
    %175 = vector.load %arg6[%c1_85, %c0_86, %c0_87] : memref<2x1x96xf32, #tpu.memory_space<vmem>>, vector<1x1x96xf32>
    %176 = vector.shape_cast %175 : vector<1x1x96xf32> to vector<1x96xf32>
    %177 = vector.broadcast %176 : vector<1x96xf32> to vector<8x96xf32>
    %178 = arith.addf %174, %177 : vector<8x96xf32>
    %179 = vector.extract_strided_slice %178 {offsets = [0, 0], sizes = [8, 32], strides = [1, 1]} : vector<8x96xf32> to vector<8x32xf32>
    %180 = vector.extract_strided_slice %178 {offsets = [0, 32], sizes = [8, 32], strides = [1, 1]} : vector<8x96xf32> to vector<8x32xf32>
    %181 = vector.extract_strided_slice %178 {offsets = [0, 64], sizes = [8, 32], strides = [1, 1]} : vector<8x96xf32> to vector<8x32xf32>
    %182 = vector.extract_strided_slice %179 {offsets = [0, 0], sizes = [8, 16], strides = [1, 1]} : vector<8x32xf32> to vector<8x16xf32>
    %183 = vector.extract_strided_slice %180 {offsets = [0, 0], sizes = [8, 16], strides = [1, 1]} : vector<8x32xf32> to vector<8x16xf32>
    %184 = vector.extract_strided_slice %181 {offsets = [0, 0], sizes = [8, 16], strides = [1, 1]} : vector<8x32xf32> to vector<8x16xf32>
    %cst_88 = arith.constant dense<0.000000e+00> : vector<8x8xf32>
    %185 = tpu.matmul %182, %183, %cst_88 {dimension_numbers = #tpu.dot_dimension_numbers<[1], [1], [0], [0], [0, 0, 1, 0], [], []>} : vector<8x16xf32>, vector<8x16xf32>, vector<8x8xf32> -> vector<8x8xf32>
    %cst_89 = arith.constant 2.500000e-01 : f32
    %186 = vector.broadcast %cst_89 : f32 to vector<8x8xf32>
    %187 = arith.mulf %185, %186 : vector<8x8xf32>
    %188 = vector.broadcast %27 : vector<1x8xf32> to vector<8x8xf32>
    %189 = arith.addf %187, %188 : vector<8x8xf32>
    %cst_90 = arith.constant dense<0xFF800000> : vector<8xf32>
    %190 = vector.multi_reduction <maximumf>, %189, %cst_90 [1] : vector<8x8xf32> to vector<8xf32>
    %191 = vector.shape_cast %190 : vector<8xf32> to vector<8x1xf32>
    %192 = vector.broadcast %191 : vector<8x1xf32> to vector<8x8xf32>
    %193 = arith.subf %189, %192 : vector<8x8xf32>
    %194 = math.exp %193 : vector<8x8xf32>
    %cst_91 = arith.constant dense<0.000000e+00> : vector<8xf32>
    %195 = vector.multi_reduction <add>, %194, %cst_91 [1] : vector<8x8xf32> to vector<8xf32>
    %196 = vector.shape_cast %195 : vector<8xf32> to vector<8x1xf32>
    %197 = tpu.reciprocal %196 {approx = true} : vector<8x1xf32> -> vector<8x1xf32>
    %198 = vector.broadcast %197 : vector<8x1xf32> to vector<8x8xf32>
    %199 = arith.mulf %194, %198 : vector<8x8xf32>
    %cst_92 = arith.constant dense<0.000000e+00> : vector<8x16xf32>
    %200 = tpu.matmul %199, %184, %cst_92 {dimension_numbers = #tpu.dot_dimension_numbers<[1], [0], [0], [1], [0, 0, 1, 1], [], []>} : vector<8x8xf32>, vector<8x16xf32>, vector<8x16xf32> -> vector<8x16xf32>
    %c0_93 = arith.constant 0 : index
    %c0_94 = arith.constant 0 : index
    %201 = vector.load %arg22[%c0_93, %c0_94] : memref<8x32xf32, #tpu.memory_space<vmem>>, vector<8x16xf32>
    tpu.vector_store %arg22[%c0_93, %c0_94], %200 {strides = array<i32>} : memref<8x32xf32, #tpu.memory_space<vmem>>, vector<8x16xf32>,
    %202 = vector.extract_strided_slice %179 {offsets = [0, 16], sizes = [8, 16], strides = [1, 1]} : vector<8x32xf32> to vector<8x16xf32>
    %203 = vector.extract_strided_slice %180 {offsets = [0, 16], sizes = [8, 16], strides = [1, 1]} : vector<8x32xf32> to vector<8x16xf32>
    %204 = vector.extract_strided_slice %181 {offsets = [0, 16], sizes = [8, 16], strides = [1, 1]} : vector<8x32xf32> to vector<8x16xf32>
    %cst_95 = arith.constant dense<0.000000e+00> : vector<8x8xf32>
    %205 = tpu.matmul %202, %203, %cst_95 {dimension_numbers = #tpu.dot_dimension_numbers<[1], [1], [0], [0], [0, 0, 1, 0], [], []>} : vector<8x16xf32>, vector<8x16xf32>, vector<8x8xf32> -> vector<8x8xf32>
    %cst_96 = arith.constant 2.500000e-01 : f32
    %206 = vector.broadcast %cst_96 : f32 to vector<8x8xf32>
    %207 = arith.mulf %205, %206 : vector<8x8xf32>
    %208 = vector.broadcast %27 : vector<1x8xf32> to vector<8x8xf32>
    %209 = arith.addf %207, %208 : vector<8x8xf32>
    %cst_97 = arith.constant dense<0xFF800000> : vector<8xf32>
    %210 = vector.multi_reduction <maximumf>, %209, %cst_97 [1] : vector<8x8xf32> to vector<8xf32>
    %211 = vector.shape_cast %210 : vector<8xf32> to vector<8x1xf32>
    %212 = vector.broadcast %211 : vector<8x1xf32> to vector<8x8xf32>
    %213 = arith.subf %209, %212 : vector<8x8xf32>
    %214 = math.exp %213 : vector<8x8xf32>
    %cst_98 = arith.constant dense<0.000000e+00> : vector<8xf32>
    %215 = vector.multi_reduction <add>, %214, %cst_98 [1] : vector<8x8xf32> to vector<8xf32>
    %216 = vector.shape_cast %215 : vector<8xf32> to vector<8x1xf32>
    %217 = tpu.reciprocal %216 {approx = true} : vector<8x1xf32> -> vector<8x1xf32>
    %218 = vector.broadcast %217 : vector<8x1xf32> to vector<8x8xf32>
    %219 = arith.mulf %214, %218 : vector<8x8xf32>
    %cst_99 = arith.constant dense<0.000000e+00> : vector<8x16xf32>
    %220 = tpu.matmul %219, %204, %cst_99 {dimension_numbers = #tpu.dot_dimension_numbers<[1], [0], [0], [1], [0, 0, 1, 1], [], []>} : vector<8x8xf32>, vector<8x16xf32>, vector<8x16xf32> -> vector<8x16xf32>
    %c0_100 = arith.constant 0 : index
    %c16_101 = arith.constant 16 : index
    %221 = vector.load %arg22[%c0_100, %c16_101] : memref<8x32xf32, #tpu.memory_space<vmem>>, vector<8x16xf32>
    tpu.vector_store %arg22[%c0_100, %c16_101], %220 {strides = array<i32>} : memref<8x32xf32, #tpu.memory_space<vmem>>, vector<8x16xf32>,
    %c0_102 = arith.constant 0 : index
    %c0_103 = arith.constant 0 : index
    %222 = vector.load %arg22[%c0_102, %c0_103] : memref<8x32xf32, #tpu.memory_space<vmem>>, vector<8x32xf32>
    %223 = arith.truncf %222 : vector<8x32xf32> to vector<8x32xbf16>
    %c1_104 = arith.constant 1 : index
    %c0_105 = arith.constant 0 : index
    %c0_106 = arith.constant 0 : index
    %224 = vector.load %arg7[%c1_104, %c0_105, %c0_106] : memref<2x32x32xbf16, #tpu.memory_space<vmem>>, vector<1x32x32xbf16>
    %225 = vector.shape_cast %224 : vector<1x32x32xbf16> to vector<32x32xbf16>
    %cst_107 = arith.constant dense<0.000000e+00> : vector<8x32xf32>
    %226 = tpu.matmul %223, %225, %cst_107 {dimension_numbers = #tpu.dot_dimension_numbers<[1], [0], [0], [1], [0, 0, 1, 1], [], []>} : vector<8x32xbf16>, vector<32x32xbf16>, vector<8x32xf32> -> vector<8x32xf32>
    %c1_108 = arith.constant 1 : index
    %c0_109 = arith.constant 0 : index
    %c0_110 = arith.constant 0 : index
    %227 = vector.load %arg8[%c1_108, %c0_109, %c0_110] : memref<2x1x32xf32, #tpu.memory_space<vmem>>, vector<1x1x32xf32>
    %228 = vector.shape_cast %227 : vector<1x1x32xf32> to vector<1x32xf32>
    %229 = vector.broadcast %228 : vector<1x32xf32> to vector<8x32xf32>
    %230 = arith.addf %226, %229 : vector<8x32xf32>
    %231 = arith.addf %230, %170 : vector<8x32xf32>
    %c1_111 = arith.constant 1 : index
    %c0_112 = arith.constant 0 : index
    %c0_113 = arith.constant 0 : index
    %232 = vector.load %arg9[%c1_111, %c0_112, %c0_113] : memref<2x1x32xf32, #tpu.memory_space<vmem>>, vector<1x1x32xf32>
    %233 = vector.shape_cast %232 : vector<1x1x32xf32> to vector<1x32xf32>
    %c1_114 = arith.constant 1 : index
    %c0_115 = arith.constant 0 : index
    %c0_116 = arith.constant 0 : index
    %234 = vector.load %arg10[%c1_114, %c0_115, %c0_116] : memref<2x1x32xf32, #tpu.memory_space<vmem>>, vector<1x1x32xf32>
    %235 = vector.shape_cast %234 : vector<1x1x32xf32> to vector<1x32xf32>
    %cst_117 = arith.constant dense<0.000000e+00> : vector<8xf32>
    %236 = vector.multi_reduction <add>, %231, %cst_117 [1] : vector<8x32xf32> to vector<8xf32>
    %237 = vector.shape_cast %236 : vector<8xf32> to vector<8x1xf32>
    %cst_118 = arith.constant 3.200000e+01 : f32
    %238 = vector.broadcast %cst_118 : f32 to vector<8x1xf32>
    %239 = arith.divf %237, %238 : vector<8x1xf32>
    %240 = vector.broadcast %239 : vector<8x1xf32> to vector<8x32xf32>
    %241 = arith.subf %231, %240 : vector<8x32xf32>
    %242 = arith.mulf %241, %241 : vector<8x32xf32>
    %cst_119 = arith.constant dense<0.000000e+00> : vector<8xf32>
    %243 = vector.multi_reduction <add>, %242, %cst_119 [1] : vector<8x32xf32> to vector<8xf32>
    %244 = vector.shape_cast %243 : vector<8xf32> to vector<8x1xf32>
    %cst_120 = arith.constant 3.200000e+01 : f32
    %245 = vector.broadcast %cst_120 : f32 to vector<8x1xf32>
    %246 = arith.divf %244, %245 : vector<8x1xf32>
    %247 = vector.broadcast %239 : vector<8x1xf32> to vector<8x32xf32>
    %248 = arith.subf %231, %247 : vector<8x32xf32>
    %cst_121 = arith.constant 9.99999996E-13 : f32
    %249 = vector.broadcast %cst_121 : f32 to vector<8x1xf32>
    %250 = arith.addf %246, %249 : vector<8x1xf32>
    %251 = math.rsqrt %250 : vector<8x1xf32>
    %252 = vector.broadcast %251 : vector<8x1xf32> to vector<8x32xf32>
    %253 = arith.mulf %248, %252 : vector<8x32xf32>
    %254 = vector.broadcast %233 : vector<1x32xf32> to vector<8x32xf32>
    %255 = arith.mulf %253, %254 : vector<8x32xf32>
    %256 = vector.broadcast %235 : vector<1x32xf32> to vector<8x32xf32>
    %257 = arith.addf %255, %256 : vector<8x32xf32>
    %258 = arith.truncf %257 : vector<8x32xf32> to vector<8x32xbf16>
    %c1_122 = arith.constant 1 : index
    %c0_123 = arith.constant 0 : index
    %c0_124 = arith.constant 0 : index
    %259 = vector.load %arg11[%c1_122, %c0_123, %c0_124] : memref<2x32x64xbf16, #tpu.memory_space<vmem>>, vector<1x32x64xbf16>
    %260 = vector.shape_cast %259 : vector<1x32x64xbf16> to vector<32x64xbf16>
    %cst_125 = arith.constant dense<0.000000e+00> : vector<8x64xf32>
    %261 = tpu.matmul %258, %260, %cst_125 {dimension_numbers = #tpu.dot_dimension_numbers<[1], [0], [0], [1], [0, 0, 1, 1], [], []>} : vector<8x32xbf16>, vector<32x64xbf16>, vector<8x64xf32> -> vector<8x64xf32>
    %c1_126 = arith.constant 1 : index
    %c0_127 = arith.constant 0 : index
    %c0_128 = arith.constant 0 : index
    %262 = vector.load %arg12[%c1_126, %c0_127, %c0_128] : memref<2x1x64xf32, #tpu.memory_space<vmem>>, vector<1x1x64xf32>
    %263 = vector.shape_cast %262 : vector<1x1x64xf32> to vector<1x64xf32>
    %264 = vector.broadcast %263 : vector<1x64xf32> to vector<8x64xf32>
    %265 = arith.addf %261, %264 : vector<8x64xf32>
    %cst_129 = arith.constant 5.000000e-01 : f32
    %266 = vector.broadcast %cst_129 : f32 to vector<8x64xf32>
    %267 = arith.mulf %266, %265 : vector<8x64xf32>
    %cst_130 = arith.constant 4.471500e-02 : f32
    %268 = vector.broadcast %cst_130 : f32 to vector<8x64xf32>
    %269 = arith.mulf %268, %265 : vector<8x64xf32>
    %270 = arith.mulf %269, %265 : vector<8x64xf32>
    %271 = arith.mulf %270, %265 : vector<8x64xf32>
    %272 = arith.addf %265, %271 : vector<8x64xf32>
    %cst_131 = arith.constant 0.797884583 : f32
    %273 = vector.broadcast %cst_131 : f32 to vector<8x64xf32>
    %274 = arith.mulf %273, %272 : vector<8x64xf32>
    %275 = math.tanh %274 : vector<8x64xf32>
    %cst_132 = arith.constant 1.000000e+00 : f32
    %276 = vector.broadcast %cst_132 : f32 to vector<8x64xf32>
    %277 = arith.addf %276, %275 : vector<8x64xf32>
    %278 = arith.mulf %267, %277 : vector<8x64xf32>
    %279 = arith.truncf %278 : vector<8x64xf32> to vector<8x64xbf16>
    %c1_133 = arith.constant 1 : index
    %c0_134 = arith.constant 0 : index
    %c0_135 = arith.constant 0 : index
    %280 = vector.load %arg13[%c1_133, %c0_134, %c0_135] : memref<2x64x32xbf16, #tpu.memory_space<vmem>>, vector<1x64x32xbf16>
    %281 = vector.shape_cast %280 : vector<1x64x32xbf16> to vector<64x32xbf16>
    %cst_136 = arith.constant dense<0.000000e+00> : vector<8x32xf32>
    %282 = tpu.matmul %279, %281, %cst_136 {dimension_numbers = #tpu.dot_dimension_numbers<[1], [0], [0], [1], [0, 0, 1, 1], [], []>} : vector<8x64xbf16>, vector<64x32xbf16>, vector<8x32xf32> -> vector<8x32xf32>
    %c1_137 = arith.constant 1 : index
    %c0_138 = arith.constant 0 : index
    %c0_139 = arith.constant 0 : index
    %283 = vector.load %arg14[%c1_137, %c0_138, %c0_139] : memref<2x1x32xf32, #tpu.memory_space<vmem>>, vector<1x1x32xf32>
    %284 = vector.shape_cast %283 : vector<1x1x32xf32> to vector<1x32xf32>
    %285 = vector.broadcast %284 : vector<1x32xf32> to vector<8x32xf32>
    %286 = arith.addf %282, %285 : vector<8x32xf32>
    %287 = arith.addf %286, %257 : vector<8x32xf32>
    %c1_140 = arith.constant 1 : index
    %c0_141 = arith.constant 0 : index
    %c0_142 = arith.constant 0 : index
    %288 = vector.load %arg15[%c1_140, %c0_141, %c0_142] : memref<2x1x32xf32, #tpu.memory_space<vmem>>, vector<1x1x32xf32>
    %289 = vector.shape_cast %288 : vector<1x1x32xf32> to vector<1x32xf32>
    %c1_143 = arith.constant 1 : index
    %c0_144 = arith.constant 0 : index
    %c0_145 = arith.constant 0 : index
    %290 = vector.load %arg16[%c1_143, %c0_144, %c0_145] : memref<2x1x32xf32, #tpu.memory_space<vmem>>, vector<1x1x32xf32>
    %291 = vector.shape_cast %290 : vector<1x1x32xf32> to vector<1x32xf32>
    %cst_146 = arith.constant dense<0.000000e+00> : vector<8xf32>
    %292 = vector.multi_reduction <add>, %287, %cst_146 [1] : vector<8x32xf32> to vector<8xf32>
    %293 = vector.shape_cast %292 : vector<8xf32> to vector<8x1xf32>
    %cst_147 = arith.constant 3.200000e+01 : f32
    %294 = vector.broadcast %cst_147 : f32 to vector<8x1xf32>
    %295 = arith.divf %293, %294 : vector<8x1xf32>
    %296 = vector.broadcast %295 : vector<8x1xf32> to vector<8x32xf32>
    %297 = arith.subf %287, %296 : vector<8x32xf32>
    %298 = arith.mulf %297, %297 : vector<8x32xf32>
    %cst_148 = arith.constant dense<0.000000e+00> : vector<8xf32>
    %299 = vector.multi_reduction <add>, %298, %cst_148 [1] : vector<8x32xf32> to vector<8xf32>
    %300 = vector.shape_cast %299 : vector<8xf32> to vector<8x1xf32>
    %cst_149 = arith.constant 3.200000e+01 : f32
    %301 = vector.broadcast %cst_149 : f32 to vector<8x1xf32>
    %302 = arith.divf %300, %301 : vector<8x1xf32>
    %303 = vector.broadcast %295 : vector<8x1xf32> to vector<8x32xf32>
    %304 = arith.subf %287, %303 : vector<8x32xf32>
    %cst_150 = arith.constant 9.99999996E-13 : f32
    %305 = vector.broadcast %cst_150 : f32 to vector<8x1xf32>
    %306 = arith.addf %302, %305 : vector<8x1xf32>
    %307 = math.rsqrt %306 : vector<8x1xf32>
    %308 = vector.broadcast %307 : vector<8x1xf32> to vector<8x32xf32>
    %309 = arith.mulf %304, %308 : vector<8x32xf32>
    %310 = vector.broadcast %289 : vector<1x32xf32> to vector<8x32xf32>
    %311 = arith.mulf %309, %310 : vector<8x32xf32>
    %312 = vector.broadcast %291 : vector<1x32xf32> to vector<8x32xf32>
    %313 = arith.addf %311, %312 : vector<8x32xf32>
    %314 = vector.extract_strided_slice %313 {offsets = [0, 0], sizes = [1, 32], strides = [1, 1]} : vector<8x32xf32> to vector<1x32xf32>
    %315 = arith.truncf %314 : vector<1x32xf32> to vector<1x32xbf16>
    %c0_151 = arith.constant 0 : index
    %c0_152 = arith.constant 0 : index
    %316 = vector.load %arg17[%c0_151, %c0_152] : memref<32x32xbf16, #tpu.memory_space<vmem>>, vector<32x32xbf16>
    %cst_153 = arith.constant dense<0.000000e+00> : vector<1x32xf32>
    %317 = tpu.matmul %315, %316, %cst_153 {dimension_numbers = #tpu.dot_dimension_numbers<[1], [0], [0], [1], [0, 0, 1, 1], [], []>} : vector<1x32xbf16>, vector<32x32xbf16>, vector<1x32xf32> -> vector<1x32xf32>
    %c0_154 = arith.constant 0 : index
    %c0_155 = arith.constant 0 : index
    %318 = vector.load %arg18[%c0_154, %c0_155] : memref<1x32xf32, #tpu.memory_space<vmem>>, vector<1x32xf32>
    %319 = arith.addf %317, %318 : vector<1x32xf32>
    %320 = math.tanh %319 : vector<1x32xf32>
    %321 = arith.truncf %320 : vector<1x32xf32> to vector<1x32xbf16>
    %c0_156 = arith.constant 0 : index
    %c0_157 = arith.constant 0 : index
    %322 = vector.load %arg19[%c0_156, %c0_157] : memref<32x4xbf16, #tpu.memory_space<vmem>>, vector<32x4xbf16>
    %cst_158 = arith.constant dense<0.000000e+00> : vector<1x4xf32>
    %323 = tpu.matmul %321, %322, %cst_158 {dimension_numbers = #tpu.dot_dimension_numbers<[1], [0], [0], [1], [0, 0, 1, 1], [], []>} : vector<1x32xbf16>, vector<32x4xbf16>, vector<1x4xf32> -> vector<1x4xf32>
    %c0_159 = arith.constant 0 : index
    %c0_160 = arith.constant 0 : index
    %324 = vector.load %arg20[%c0_159, %c0_160] : memref<1x4xf32, #tpu.memory_space<vmem>>, vector<1x4xf32>
    %325 = arith.addf %323, %324 : vector<1x4xf32>
    %cst_161 = arith.constant dense<0xFF800000> : vector<1xf32>
    %326 = vector.multi_reduction <maximumf>, %325, %cst_161 [1] : vector<1x4xf32> to vector<1xf32>
    %327 = vector.shape_cast %326 : vector<1xf32> to vector<1x1xf32>
    %328 = vector.broadcast %327 : vector<1x1xf32> to vector<1x4xf32>
    %329 = arith.subf %325, %328 : vector<1x4xf32>
    %330 = math.exp %329 : vector<1x4xf32>
    %cst_162 = arith.constant dense<0.000000e+00> : vector<1xf32>
    %331 = vector.multi_reduction <add>, %330, %cst_162 [1] : vector<1x4xf32> to vector<1xf32>
    %332 = vector.shape_cast %331 : vector<1xf32> to vector<1x1xf32>
    %333 = vector.broadcast %332 : vector<1x1xf32> to vector<1x4xf32>
    %334 = arith.divf %330, %333 : vector<1x4xf32>
    %c0_163 = arith.constant 0 : index
    %c0_164 = arith.constant 0 : index
    %c0_165 = arith.constant 0 : index
    %335 = vector.load %arg21[%c0_163, %c0_164, %c0_165] : memref<1x1x4xf32, #tpu.memory_space<vmem>>, vector<1x1x4xf32>
    %336 = vector.shape_cast %335 : vector<1x1x4xf32> to vector<1x4xf32>
    %337 = vector.shape_cast %334 : vector<1x4xf32> to vector<1x1x4xf32>
    tpu.vector_store %arg21[%c0_163, %c0_164, %c0_165], %337 {strides = array<i32>} : memref<1x1x4xf32, #tpu.memory_space<vmem>>, vector<1x1x4xf32>,
    return
  }
  func.func @transform_0(%arg0: i32) -> (i32, i32, i32) {
    %c0_i32 = arith.constant 0 : i32
    %c0_i32_0 = arith.constant 0 : i32
    %c0_i32_1 = arith.constant 0 : i32
    return %arg0, %c0_i32, %c0_i32_0 : i32, i32, i32
  }
  func.func @transform_1(%arg0: i32) -> (i32, i32, i32) {
    %c0_i32 = arith.constant 0 : i32
    %c0_i32_0 = arith.constant 0 : i32
    %c0_i32_1 = arith.constant 0 : i32
    return %arg0, %c0_i32, %c0_i32_0 : i32, i32, i32
  }
  func.func @transform_2(%arg0: i32) -> (i32, i32) {
    %c0_i32 = arith.constant 0 : i32
    %c0_i32_0 = arith.constant 0 : i32
    %c0_i32_1 = arith.constant 0 : i32
    return %c0_i32, %c0_i32_0 : i32, i32
  }
  func.func @transform_3(%arg0: i32) -> (i32, i32) {
    %c0_i32 = arith.constant 0 : i32
    %c0_i32_0 = arith.constant 0 : i32
    %c0_i32_1 = arith.constant 0 : i32
    return %c0_i32, %c0_i32_0 : i32, i32
  }
  func.func @transform_4(%arg0: i32) -> (i32, i32, i32) {
    %c0_i32 = arith.constant 0 : i32
    %c0_i32_0 = arith.constant 0 : i32
    %c0_i32_1 = arith.constant 0 : i32
    %c0_i32_2 = arith.constant 0 : i32
    return %c0_i32, %c0_i32_0, %c0_i32_1 : i32, i32, i32
  }
  func.func @transform_5(%arg0: i32) -> (i32, i32, i32) {
    %c0_i32 = arith.constant 0 : i32
    %c0_i32_0 = arith.constant 0 : i32
    %c0_i32_1 = arith.constant 0 : i32
    %c0_i32_2 = arith.constant 0 : i32
    return %c0_i32, %c0_i32_0, %c0_i32_1 : i32, i32, i32
  }
  func.func @transform_6(%arg0: i32) -> (i32, i32, i32) {
    %c0_i32 = arith.constant 0 : i32
    %c0_i32_0 = arith.constant 0 : i32
    %c0_i32_1 = arith.constant 0 : i32
    %c0_i32_2 = arith.constant 0 : i32
    return %c0_i32, %c0_i32_0, %c0_i32_1 : i32, i32, i32
  }
  func.func @transform_7(%arg0: i32) -> (i32, i32, i32) {
    %c0_i32 = arith.constant 0 : i32
    %c0_i32_0 = arith.constant 0 : i32
    %c0_i32_1 = arith.constant 0 : i32
    %c0_i32_2 = arith.constant 0 : i32
    return %c0_i32, %c0_i32_0, %c0_i32_1 : i32, i32, i32
  }
  func.func @transform_8(%arg0: i32) -> (i32, i32, i32) {
    %c0_i32 = arith.constant 0 : i32
    %c0_i32_0 = arith.constant 0 : i32
    %c0_i32_1 = arith.constant 0 : i32
    %c0_i32_2 = arith.constant 0 : i32
    return %c0_i32, %c0_i32_0, %c0_i32_1 : i32, i32, i32
  }
  func.func @transform_9(%arg0: i32) -> (i32, i32, i32) {
    %c0_i32 = arith.constant 0 : i32
    %c0_i32_0 = arith.constant 0 : i32
    %c0_i32_1 = arith.constant 0 : i32
    %c0_i32_2 = arith.constant 0 : i32
    return %c0_i32, %c0_i32_0, %c0_i32_1 : i32, i32, i32
  }
  func.func @transform_10(%arg0: i32) -> (i32, i32, i32) {
    %c0_i32 = arith.constant 0 : i32
    %c0_i32_0 = arith.constant 0 : i32
    %c0_i32_1 = arith.constant 0 : i32
    %c0_i32_2 = arith.constant 0 : i32
    return %c0_i32, %c0_i32_0, %c0_i32_1 : i32, i32, i32
  }
  func.func @transform_11(%arg0: i32) -> (i32, i32, i32) {
    %c0_i32 = arith.constant 0 : i32
    %c0_i32_0 = arith.constant 0 : i32
    %c0_i32_1 = arith.constant 0 : i32
    %c0_i32_2 = arith.constant 0 : i32
    return %c0_i32, %c0_i32_0, %c0_i32_1 : i32, i32, i32
  }
  func.func @transform_12(%arg0: i32) -> (i32, i32, i32) {
    %c0_i32 = arith.constant 0 : i32
    %c0_i32_0 = arith.constant 0 : i32
    %c0_i32_1 = arith.constant 0 : i32
    %c0_i32_2 = arith.constant 0 : i32
    return %c0_i32, %c0_i32_0, %c0_i32_1 : i32, i32, i32
  }
  func.func @transform_13(%arg0: i32) -> (i32, i32, i32) {
    %c0_i32 = arith.constant 0 : i32
    %c0_i32_0 = arith.constant 0 : i32
    %c0_i32_1 = arith.constant 0 : i32
    %c0_i32_2 = arith.constant 0 : i32
    return %c0_i32, %c0_i32_0, %c0_i32_1 : i32, i32, i32
  }
  func.func @transform_14(%arg0: i32) -> (i32, i32, i32) {
    %c0_i32 = arith.constant 0 : i32
    %c0_i32_0 = arith.constant 0 : i32
    %c0_i32_1 = arith.constant 0 : i32
    %c0_i32_2 = arith.constant 0 : i32
    return %c0_i32, %c0_i32_0, %c0_i32_1 : i32, i32, i32
  }
  func.func @transform_15(%arg0: i32) -> (i32, i32, i32) {
    %c0_i32 = arith.constant 0 : i32
    %c0_i32_0 = arith.constant 0 : i32
    %c0_i32_1 = arith.constant 0 : i32
    %c0_i32_2 = arith.constant 0 : i32
    return %c0_i32, %c0_i32_0, %c0_i32_1 : i32, i32, i32
  }
  func.func @transform_16(%arg0: i32) -> (i32, i32) {
    %c0_i32 = arith.constant 0 : i32
    %c0_i32_0 = arith.constant 0 : i32
    %c0_i32_1 = arith.constant 0 : i32
    return %c0_i32, %c0_i32_0 : i32, i32
  }
  func.func @transform_17(%arg0: i32) -> (i32, i32) {
    %c0_i32 = arith.constant 0 : i32
    %c0_i32_0 = arith.constant 0 : i32
    %c0_i32_1 = arith.constant 0 : i32
    return %c0_i32, %c0_i32_0 : i32, i32
  }
  func.func @transform_18(%arg0: i32) -> (i32, i32) {
    %c0_i32 = arith.constant 0 : i32
    %c0_i32_0 = arith.constant 0 : i32
    %c0_i32_1 = arith.constant 0 : i32
    return %c0_i32, %c0_i32_0 : i32, i32
  }
  func.func @transform_19(%arg0: i32) -> (i32, i32) {
    %c0_i32 = arith.constant 0 : i32
    %c0_i32_0 = arith.constant 0 : i32
    %c0_i32_1 = arith.constant 0 : i32
    return %c0_i32, %c0_i32_0 : i32, i32
  }
  func.func @transform_20(%arg0: i32) -> (i32, i32, i32) {
    %c0_i32 = arith.constant 0 : i32
    %c0_i32_0 = arith.constant 0 : i32
    %c0_i32_1 = arith.constant 0 : i32
    return %arg0, %c0_i32, %c0_i32_0 : i32, i32, i32
  }
}

</mosaic_0001>

<bundles_post_ra>
// kernel: _lambda_.1
= control target key start
LH: loop header
LB: loop body
LE: loop exit
PB: predicated region body
PF: predicated region fallthrough
CT: control target
= control target key end

     0   :  { %s3239_s0 = inlined_call_operand.vmem [shape: f32[2,8,32], index: 0, kind: input, shape index: {}]   ;;  %s3240_s1 = inlined_call_operand.vmem [shape: f32[2,1,8], index: 1, kind: input, shape index: {}]   ;;  %s3241_s2 = inlined_call_operand.vmem [shape: f32[1,32], index: 2, kind: input, shape index: {}]   ;;  %s3242_s3 = inlined_call_operand.vmem [shape: f32[1,32], index: 3, kind: input, shape index: {}]   ;;  %s3243_s4 = inlined_call_operand.vmem [shape: bf16[2,32,96], index: 4, kind: input, shape index: {}]   ;;  %s3244_s5 = inlined_call_operand.vmem [shape: f32[2,1,96], index: 5, kind: input, shape index: {}]   ;;  %s3245_s6 = inlined_call_operand.vmem [shape: bf16[2,32,32], index: 6, kind: input, shape index: {}]   ;;  %s3246_s7 = inlined_call_operand.vmem [shape: f32[2,1,32], index: 7, kind: input, shape index: {}]   ;;  %s3247_s8 = inlined_call_operand.vmem [shape: f32[2,1,32], index: 8, kind: input, shape index: {}]   ;;  %s3248_s9 = inlined_call_operand.vmem [shape: f32[2,1,32], index: 9, kind: input, shape index: {}]   ;;  %s3249_s10 = inlined_call_operand.vmem [shape: bf16[2,32,64], index: 10, kind: input, shape index: {}]   ;;  %s3250_s11 = inlined_call_operand.vmem [shape: f32[2,1,64], index: 11, kind: input, shape index: {}]   ;;  %s3251_s12 = inlined_call_operand.vmem [shape: bf16[2,64,32], index: 12, kind: input, shape index: {}]   ;;  %s3252_s13 = inlined_call_operand.vmem [shape: f32[2,1,32], index: 13, kind: input, shape index: {}]   ;;  %s3253_s14 = inlined_call_operand.vmem [shape: f32[2,1,32], index: 14, kind: input, shape index: {}]   ;;  %s3254_s15 = inlined_call_operand.vmem [shape: f32[2,1,32], index: 15, kind: input, shape index: {}]   ;;  %s3255_s16 = inlined_call_operand.vmem [shape: bf16[32,32], index: 16, kind: input, shape index: {}]   ;;  %s3256_s17 = inlined_call_operand.vmem [shape: f32[1,32], index: 17, kind: input, shape index: {}]   ;;  %s3257_s18 = inlined_call_operand.vmem [shape: bf16[32,4], index: 18, kind: input, shape index: {}]   ;;  %s3258_s19 = inlined_call_operand.vmem [shape: f32[1,4], index: 19, kind: input, shape index: {}]   ;;  %s3259_s20 = inlined_call_operand.hbm [shape: f32[2,1,4], index: 20, kind: output, shape index: {}]  }
   0x1   :  { %3271 = sst [smem:[#allocation10_spill]] %s3239_s0 }
   0x2   :  { %3272 = sst [smem:[#allocation11_spill]] %s3240_s1 }
   0x3   :  { %3273 = sst [smem:[#allocation12_spill]] %s3241_s2 }
   0x4   :  { %3274 = sst [smem:[#allocation13_spill]] %s3242_s3 }
   0x5   :  { %3275 = sst [smem:[#allocation14_spill]] %s3243_s4 }
   0x6   :  { %3276 = sst [smem:[#allocation15_spill]] %s3244_s5 }
   0x7   :  { %25 = vsyncpa [#allocation4], 0 }
   0x8   :  { %27 = vsyncpa [#allocation4 + $0x1], 0  ;;  %s2857_s1 = smov 0   ;;  %s2859_s22 = smov 0  }
   0x9   :  { %s2861_s23 = smov 0   ;;  %s2863_s24 = smov 0  }
   0xa LB: > { %3277 = sst [smem:[#allocation6_spill]] %s2737_s23  ;;  %s2878_s2 = sadd.s32 4294967295, %s2741_s24   ;;  %s2741_s24 = sphi %s2863_s24, %s3295_s24   ;;  %s2737_s23 = sphi %s2861_s23, %s3297_s23   ;;  %s2733_s22 = sphi %s2859_s22, %s3299_s22   ;;  %s2729_s1 = sphi %s2857_s1, %s3298_s1  }
   0xb   : > { %s2293_s25 = sadd.s32 4294967294, %s2741_s24   ;;  %s2882_s3 = sadd.s32 1, %s2741_s24  }
   0xc   : > { %3278 = sst [smem:[#allocation7_spill]] %s2882_s3  ;;  %s470_s26 = sadd.s32 1, %s2737_s23 }
   0xd   : > { %s467_s27 = ssub.s32 %s2741_s24, %s2882_s3  ;;  %p480_p0 = scmp.ne.s32.totalorder %s2737_s23, %s2733_s22 }
   0xe   : > { %p468_p1 = scmp.eq.s32.totalorder %s467_s27, 0  ;;  %p481_p2 = scmp.eq.s32.totalorder %s2878_s2, 1 }
   0xf   : > { %p486_p3 = scmp.ne.s32.totalorder %s2733_s22, %s2729_s1  ;;  %p487_p4 = scmp.eq.s32.totalorder %s2293_s25, 1 }
  0x10   : > { %s2893_s28 = scalar_select %p468_p1, %s2737_s23, %s470_s26  }
  0x11   : > { %p2895_p5 = por %p481_p2, %p480_p0  ;;  %p2899_p6 = por %p487_p4, %p486_p3 }
  0x12   : > { %3279 = sst [smem:[#allocation8_spill]] %s2893_s28  ;;  %p2296_p7 = scmp.ge.s32.totalorder %s2741_s24, 1 }
  0x13   : > { %s3281_s29 = scalar_select %p2899_p6, 1, 0 }
  0x14   : > { %p572_p8 = scmp.lt.s32.totalorder %s2741_s24, 3 }
  0x15   : > { %3282 = sst [smem:[#allocation9_spill]] %s3281_s29 }
  0x16   : > { %p573_p9 = pnand %p2296_p7, %p572_p8 }
  0x17   : > { %p631_p10 = scmp.lt.s32.totalorder (!%p573_p9), %s2878_s2, 1  ;;  %vm642_vm0 = vcmask (!%p573_p9), 261120   ;;  %s3283_s26 = sld [smem:[#allocation10_spill]] (!%p573_p9)  ;;  %v2743_v8 = vmov (!%p573_p9), 0.0   ;;  %vm2744_vm1 = vmmov (!%p573_p9), 0   ;;  %vm742_vm2 = vcmask (!%p573_p9), 130048  }
  0x18   : > { %576 = sbr.rel (%p573_p9) target bundleno = 6662 (0x1a06), region = 100  ;;  %s3284_s3 = sld [smem:[#allocation14_spill]] (!%p573_p9)  ;;  %2444 = vmatprep.subr.bf16.mxu0 (!%p573_p9), %v2743_v8  ;;  %2452 = vmatprep.subr.mxu1 (!%p573_p9), %v2743_v8  ;;  %vm825_vm3 = vcmask (!%p573_p9), 64512   ;;  %v2621_v60 = vld [vmem:[%s3245_s6] sm:$0xff] (!%p573_p9)   ;;  %v2622_v61 = vld [vmem:[%s3245_s6 + $0x8] sm:$0xff] (!%p573_p9)   ;;  %vm1085_vm4 = vcmask (!%p573_p9), 261248  }
  0x19   : > { %2448 = vmatprep.mubr.msk.bf16.mxu0 (!%p573_p9), %vm2744_vm1, %v2743_v8  ;;  %2454 = vmatprep.mubr.msk.f32.mxu1 (!%p573_p9), %vm2744_vm1, %v2743_v8  ;;  %s3285_s25 = sld [smem:[#allocation12_spill]] (!%p573_p9)  ;;  %s3287_s5 = sld [smem:[#allocation15_spill]] (!%p573_p9)  ;;  %vm1301_vm5 = vcmask (!%p573_p9), 523264   ;;  %vm2203_vm6 = vcmask (!%p573_p9), 24576  }
  0x1a   : > { %s3265_s23 = smov (!%p573_p9), 64   ;;  %s3269_s28 = smov (!%p573_p9), 96  }
  0x1b   : > { %s3267_s21 = smov (!%p573_p9), 48   ;;  %s3292_s29 = smov (!%p573_p9), 64  }
  0x1e   : > { %v2619_v7 = vld [vmem:[%s3284_s3] sm:$0xff] (!%p573_p9)   ;;  %v2620_v9 = vld [vmem:[%s3284_s3 + $0x8] sm:$0xff] (!%p573_p9)  }
  0x1f   : > { %s2907_s30 = scalar_select %p631_p10, %s2878_s2, 1  ;;  %2445 = vmatpush3.bf16.msra.mxu0 %v2619_v7  ;;  %v2298_v14 = vld [vmem:[%s3285_s25] ss:$0 sm:$0xff] }
  0x20   : > { %2446 = vmatprep.subr.bf16.mxu0 %v2743_v8  ;;  %v2300_v20 = vld [vmem:[%s3287_s5] ss:$0 sm:$0xff]  ;;  %s2747_s25 = smov 80  }
  0x21   : > { %s2297_s0 = sshll.u32 %s2907_s30, 3 }
  0x22   : > { %s634_s27 = scalar_lea.vmem %s3283_s26, %s2297_s0  ;;  %s3286_s0 = sld [smem:[#allocation13_spill]] }
  0x23   : > { %v639_v0 = vld [vmem:[%s634_s27] sm:$0xff]  ;;  %2447 = vmatpush3.bf16.msra.mxu0 %v2620_v9  ;;  %s3288_s27 = sld [smem:[#allocation11_spill]] }
  0x24   : > { %v643_v1 = vsel %vm642_vm0, %v639_v0, 0.0  ;;  %2467 = vmatprep.subr.mxu0 %v2743_v8 }
  0x25   : > { %644 = vadd.xlane.f32.xlu0 %v643_v1 }
  0x28   : > { %v2299_v16 = vld [vmem:[%s3286_s0] ss:$0 sm:$0xff] }
  0x29   : > { %s637_s0 = scalar_lea.vmem %s3288_s27, %s2907_s30  ;;  %s3268_s30 = smov 112  }
  0x2a   : > { %v2958_v28 = vld [vmem:[%s637_s0] ss:$0 sm:$0xff]  ;;  %s3289_s27 = smov 96   ;;  %s3290_s0 = smov 112  }
  0xb2   : > { %v645_v2 = vpop.xlane.xlu0 %644 }
  0xb3   : > { %v647_v3 = vmul.f32 0.03125, %v645_v2 }
  0xb5   : > { %v648_v4 = vsub.f32 %v639_v0, %v647_v3  ;;  %v2311_v3 = vld [vmem:[%s3246_s7] ss:$0 sm:$0xff] }
  0xb7   : > { %v649_v5 = vmul.f32 %v648_v4, %v648_v4 }
  0xb9   : > { %v650_v6 = vsel %vm642_vm0, %v649_v5, 0.0 }
  0xba   : > { %651 = vadd.xlane.f32.xlu0 %v650_v6 }
 0x147   : > { %v652_v10 = vpop.xlane.xlu0 %651 }
 0x148   : > { %v653_v11 = vmul.f32 0.03125, %v652_v10 }
 0x14a   : > { %v654_v12 = vadd.f32 1e-12, %v653_v11 }
 0x14c   : > { %2643 = vrsqrt.f32 %v654_v12 }
 0x156   : > { %v2644_v13 = vpop.eup %2643 }
 0x157   : > { %v656_v15 = vmul.f32 %v2644_v13, %v648_v4 }
 0x159   : > { %v663_v17 = vmul.f32 %v2298_v14, %v656_v15 }
 0x15b   : > { %v2935_v18 = vadd.f32 %v2299_v16, %v663_v17  ;;  %v2623_v17 = vld [vmem:[%s3249_s10] sm:$0xff]  }
 0x15d   : > { %v672_v19 = vpack.c.bf16 %v2935_v18, %v2935_v18 }
 0x15f   : > { %2449 = vmatmul.mubr.msk.bf16.vlgmr.msra.gmra.mrb[0].mxu0 %vm642_vm0, %v672_v19  ;;  %v2624_v19 = vld [vmem:[%s3249_s10 + $0x8] sm:$0xff]  }
 0x160   : > { %2469 = vmatprep.mubr.msk.f32.mxu0 %vm2744_vm1, %v2743_v8 }
 0x232   : > { %v733_v21 = vpop.f32.mrb[0].mxu0 }
 0x233   : > { %v734_v22 = vadd.f32 %v2300_v20, %v733_v21  ;;  %v2450_v23 = vpop.f32.mrb[1].mxu0 }
 0x234   : > { %v736_v24 = vpop.f32.mrb[2].mxu0  ;;  %v2315_v23 = vld [vmem:[%s3247_s8] ss:$0 sm:$0xff] }
 0x235   : > { %837 = vrot.lane.b32.xlu0 %v734_v22, %s3265_s23  ;;  %740 = vrot.lane.b32.xlu1 %v734_v22, %s3269_s28  ;;  %v2451_v25 = vpop.f32.mrb[3].mxu0  ;;  %s3266_s23 = smov 16  }
 0x236   : > { %v2316_v25 = vld [vmem:[%s3248_s9] ss:$0 sm:$0xff] }
 0x239   : > { %916 = vrot.lane.b32.xlu0 %v734_v22, %s2747_s25 }
 0x2a7   : > { %v741_v26 = vpop.permute.xlu1 %740  ;;  %v838_v27 = vpop.permute.xlu0 %837 }
 0x2a8   : > { %2453 = vmatpush3.xpose.msk.msra.mxu1 %vm742_vm2, %v741_v26 }
 0x2a9   : > { %2457 = vmatprep.subr.mxu1 %v2743_v8 }
 0x2ab   : > { %2455 = vmatmul.mubr.msk.f32.vlgmr.msra.gmra.mrb[0].mxu1 %vm742_vm2, %v734_v22  ;;  %v917_v39 = vpop.permute.xlu0 %916 }
 0x2ac   : > { %2458 = vmatpush3.msra.mxu1 %v838_v27  ;;  %2459 = vmatprep.mubr.msk.f32.mxu1 %vm2744_vm1, %v2743_v8 }
 0x2ad   : > { %2462 = vmatprep.subr.mxu1 %v2743_v8 }
 0x37e   : > { %v813_v29 = vpop.f32.mrb[0].mxu1 }
 0x37f   : > { %v817_v30 = vmul.f32 0.25, %v813_v29  ;;  %v2456_v31 = vpop.f32.mrb[1].mxu1 }
 0x380   : > { %v2626_v31 = vld [vmem:[%s3251_s12 + $0x8] sm:$0xff]  }
 0x381   : > { %v824_v32 = vadd.f32 %v2958_v28, %v817_v30  ;;  %v2625_v30 = vld [vmem:[%s3251_s12] sm:$0xff]  }
 0x383   : > { %v826_v33 = vsel %vm825_vm3, %v824_v32, -inf }
 0x384   : > { %827 = vmax.xlane.f32.xlu1 %v826_v33  ;;  %v2628_v33 = vld [vmem:[%s3251_s12 + $0x18] sm:$0xff]  }
 0x411   : > { %v828_v34 = vpop.xlane.xlu1 %827 }
 0x412   : > { %v829_v35 = vsub.f32 %v824_v32, %v828_v34  ;;  %v2627_v32 = vld [vmem:[%s3251_s12 + $0x10] sm:$0xff]   ;;  %v2317_v34 = vld [vmem:[%s3250_s11] ss:$0 sm:$0xff] }
 0x414   : > { %v830_v36 = vmul.f32 1.442695, %v829_v35 }
 0x416   : > { %2645 = vpow2.f32 %v830_v36 }
 0x420   : > { %v2646_v37 = vpop.eup %2645 }
 0x421   : > { %v832_v38 = vsel %vm825_vm3, %v2646_v37, 0.0 }
 0x422   : > { %833 = vadd.xlane.f32.xlu0 %v832_v38 }
 0x438   : > { %914 = vrot.lane.b32.xlu0 %v734_v22, %s3268_s30 }
 0x4af   : > { %v834_v40 = vpop.xlane.xlu0 %833 }
 0x4b0   : > { %2647 = vrcp.f32 %v834_v40 }
 0x4b3   : > { %v915_v43 = vpop.permute.xlu0 %914 }
 0x4ba   : > { %v2648_v41 = vpop.eup %2647 }
 0x4bb   : > { %v836_v42 = vmul.f32 %v2648_v41, %v2646_v37 }
 0x4bd   : > { %2460 = vmatmul.mubr.msk.f32.vlgmr.msra.gmra.mrb[2].mxu1 %vm825_vm3, %v836_v42 }
 0x4be   : > { %2463 = vmatpush3.xpose.msk.msra.mxu1 %vm742_vm2, %v917_v39  ;;  %2464 = vmatprep.mubr.msk.f32.mxu1 %vm2744_vm1, %v2743_v8 }
 0x4bf   : > { %2472 = vmatprep.subr.bf16.mxu1 %v2743_v8 }
 0x4c1   : > { %2465 = vmatmul.mubr.msk.f32.vlgmr.msra.gmra.mrb[4].mxu1 %vm742_vm2, %v915_v43 }
 0x4c2   : > { %2476 = vmatprep.mubr.msk.bf16.mxu1 %vm2744_vm1, %v2743_v8  ;;  %2473 = vmatpush3.bf16.msra.mxu1 %v2621_v60 }
 0x4c3   : > { %2474 = vmatprep.subr.bf16.mxu1 %v2743_v8 }
 0x4c6   : > { %2475 = vmatpush3.bf16.msra.mxu1 %v2622_v61 }
 0x4c7   : > { %2488 = vmatprep.subr.bf16.mxu1 %v2743_v8 }
 0x590   : > { %v909_v44 = vpop.f32.mrb[2].mxu1 }
 0x591   : > { %913 = vst.msk [vmem:[#allocation2] sm:$0xff] %vm742_vm2, %v909_v44  ;;  %v2461_v45 = vpop.f32.mrb[3].mxu1 }
 0x594   : > { %v988_v46 = vpop.f32.mrb[4].mxu1 }
 0x595   : > { %v992_v47 = vmul.f32 0.25, %v988_v46  ;;  %v2466_v48 = vpop.f32.mrb[5].mxu1 }
 0x597   : > { %v993_v49 = vadd.f32 %v2958_v28, %v992_v47 }
 0x599   : > { %v994_v50 = vsel %vm825_vm3, %v993_v49, -inf }
 0x59a   : > { %995 = vmax.xlane.f32.xlu1 %v994_v50  ;;  %v2321_v50 = vld [vmem:[%s3252_s13] ss:$0 sm:$0xff] }
 0x5ab   : > { %1005 = vrot.lane.b32.xlu1 %v734_v22, %s3267_s21  ;;  %s3293_s21 = smov 16  }
 0x627   : > { %v996_v51 = vpop.xlane.xlu1 %995 }
 0x628   : > { %v997_v52 = vsub.f32 %v993_v49, %v996_v51 }
 0x62a   : > { %v998_v53 = vmul.f32 1.442695, %v997_v52 }
 0x62b   : > { %v1006_v54 = vpop.permute.xlu1 %1005 }
 0x62c   : > { %2649 = vpow2.f32 %v998_v53  ;;  %2468 = vmatpush3.msra.mxu0 %v1006_v54 }
 0x62d   : > { %2480 = vmatprep.subr.bf16.mxu0 %v2743_v8 }
 0x636   : > { %v2650_v55 = vpop.eup %2649 }
 0x637   : > { %v1000_v56 = vsel %vm825_vm3, %v2650_v55, 0.0 }
 0x638   : > { %1001 = vadd.xlane.f32.xlu0 %v1000_v56 }
 0x6c5   : > { %v1002_v57 = vpop.xlane.xlu0 %1001 }
 0x6c6   : > { %2651 = vrcp.f32 %v1002_v57 }
 0x6d0   : > { %v2652_v58 = vpop.eup %2651 }
 0x6d1   : > { %v1004_v59 = vmul.f32 %v2652_v58, %v2650_v55 }
 0x6d3   : > { %2470 = vmatmul.mubr.msk.f32.vlgmr.msra.gmra.mrb[4].mxu0 %vm825_vm3, %v1004_v59 }
 0x6d4   : > { %2484 = vmatprep.mubr.msk.bf16.mxu0 %vm2744_vm1, %v2743_v8  ;;  %2481 = vmatpush3.bf16.msra.mxu0 %v2623_v17 }
 0x6d5   : > { %2482 = vmatprep.subr.bf16.mxu0 %v2743_v8 }
 0x6d8   : > { %2483 = vmatpush3.bf16.msra.mxu0 %v2624_v19 }
 0x6d9   : > { %2500 = vmatprep.subr.bf16.mxu0 %v2743_v8 }
 0x7a6   : > { %v1077_v62 = vpop.f32.mrb[4].mxu0 }
 0x7a7   : > { %1082 = vrot.lane.b32.xlu1 %v1077_v62, %s3266_s23  ;;  %v2471_v63 = vpop.f32.mrb[5].mxu0 }
 0x7a8   : > { %v2629_v63 = vld [vmem:[%s3284_s3 + $0x10] sm:$0xff]  }
 0x819   : > { %v1083_v0 = vpop.permute.xlu1 %1082 }
 0x81a   : > { %1086 = vst.msk [vmem:[#allocation2] sm:$0xff] %vm1085_vm4, %v1083_v0  ;;  %v2630_v0 = vld [vmem:[%s3284_s3 + $0x18] sm:$0xff]  }
 0x821   : > { %v1087_v1 = vld [vmem:[#allocation2] sm:$0xff] }
 0x822   : > { %v1088_v2 = vpack.c.bf16 %v1087_v1, %v1087_v1 }
 0x824   : > { %2477 = vmatmul.mubr.msk.bf16.vlgmr.msra.gmra.mrb[8].mxu1 %vm642_vm0, %v1088_v2 }
 0x825   : > { %2496 = vmatprep.mubr.msk.bf16.mxu1 %vm2744_vm1, %v2743_v8  ;;  %2489 = vmatpush3.bf16.msra.mxu1 %v2625_v30 }
 0x826   : > { %2490 = vmatprep.subr.bf16.mxu1 %v2743_v8 }
 0x829   : > { %2491 = vmatpush3.bf16.msra.mxu1 %v2626_v31 }
 0x82a   : > { %2492 = vmatprep.subr.bf16.mxu1 %v2743_v8 }
 0x82d   : > { %2493 = vmatpush3.bf16.msra.mxu1 %v2627_v32 }
 0x82e   : > { %2494 = vmatprep.subr.bf16.mxu1 %v2743_v8 }
 0x831   : > { %2495 = vmatpush3.bf16.msra.mxu1 %v2628_v33 }
 0x832   : > { %2518 = vmatprep.subr.mxu1 %v2743_v8 }
 0x8f7   : > { %v1149_v4 = vpop.f32.mrb[8].mxu1 }
 0x8f8   : > { %v1150_v5 = vadd.f32 %v2311_v3, %v1149_v4  ;;  %v2478_v6 = vpop.f32.mrb[9].mxu1 }
 0x8f9   : > { %v1152_v7 = vpop.f32.mrb[10].mxu1 }
 0x8fa   : > { %v2479_v9 = vpop.f32.mrb[11].mxu1  ;;  %v1155_v10 = vadd.f32 %v1150_v5, %v2935_v18  ;;  %v2327_v5 = vld [vmem:[%s3253_s14] ss:$0 sm:$0xff] }
 0x8fb   : > { %v2328_v7 = vld [vmem:[%s3254_s15] ss:$0 sm:$0xff] }
 0x8fc   : > { %v1158_v11 = vsel %vm642_vm0, %v1155_v10, 0.0 }
 0x8fd   : > { %1159 = vadd.xlane.f32.xlu1 %v1158_v11 }
 0x98a   : > { %v1160_v12 = vpop.xlane.xlu1 %1159 }
 0x98b   : > { %v1161_v13 = vmul.f32 0.03125, %v1160_v12  ;;  %v2334_v12 = vld [vmem:[%s3287_s5 + $0x1] ss:$0 sm:$0xff] }
 0x98d   : > { %v1162_v14 = vsub.f32 %v1155_v10, %v1161_v13 }
 0x98f   : > { %v1163_v15 = vmul.f32 %v1162_v14, %v1162_v14 }
 0x991   : > { %v1164_v16 = vsel %vm642_vm0, %v1163_v15, 0.0 }
 0x992   : > { %1165 = vadd.xlane.f32.xlu0 %v1164_v16 }
 0xa1f   : > { %v1166_v18 = vpop.xlane.xlu0 %1165 }
 0xa20   : > { %v1167_v20 = vmul.f32 0.03125, %v1166_v18 }
 0xa22   : > { %v1168_v21 = vadd.f32 1e-12, %v1167_v20 }
 0xa24   : > { %2653 = vrsqrt.f32 %v1168_v21 }
 0xa2e   : > { %v2654_v22 = vpop.eup %2653 }
 0xa2f   : > { %v1170_v24 = vmul.f32 %v2654_v22, %v1162_v14 }
 0xa31   : > { %v1177_v26 = vmul.f32 %v2315_v23, %v1170_v24 }
 0xa33   : > { %v1184_v27 = vadd.f32 %v2316_v25, %v1177_v26 }
 0xa35   : > { %v1185_v29 = vpack.c.bf16 %v1184_v27, %v1184_v27 }
 0xa37   : > { %2485 = vmatmul.mubr.msk.bf16.vlgmr.msra.gmra.mrb[8].mxu0 %vm642_vm0, %v1185_v29 }
 0xa38   : > { %2504 = vmatprep.mubr.msk.bf16.mxu0 %vm2744_vm1, %v2743_v8  ;;  %2501 = vmatpush3.bf16.msra.mxu0 %v2629_v63 }
 0xa39   : > { %2502 = vmatprep.subr.bf16.mxu0 %v2743_v8 }
 0xa3c   : > { %2503 = vmatpush3.bf16.msra.mxu0 %v2630_v0 }
 0xa3d   : > { %2508 = vmatprep.subr.mxu0 %v2743_v8 }
 0xb0a   : > { %v1246_v35 = vpop.f32.mrb[8].mxu0 }
 0xb0b   : > { %v1247_v36 = vadd.f32 %v2317_v34, %v1246_v35  ;;  %v2486_v37 = vpop.f32.mrb[9].mxu0 }
 0xb0c   : > { %v1249_v38 = vpop.f32.mrb[10].mxu0 }
 0xb0d   : > { %v1253_v39 = vmul.f32 0.044715, %v1247_v36  ;;  %v2487_v40 = vpop.f32.mrb[11].mxu0  ;;  %v1252_v46 = vmul.f32 0.5, %v1247_v36 }
 0xb0f   : > { %v1254_v41 = vmul.f32 %v1253_v39, %v1247_v36 }
 0xb11   : > { %v1255_v42 = vmul.f32 %v1254_v41, %v1247_v36 }
 0xb13   : > { %v1256_v43 = vadd.f32 %v1255_v42, %v1247_v36 }
 0xb15   : > { %v1257_v44 = vmul.f32 0.7978846, %v1256_v43 }
 0xb17   : > { %2655 = vtanh.f32 %v1257_v44 }
 0xb21   : > { %v2656_v45 = vpop.eup %2655 }
 0xb22   : > { %v1259_v47 = vadd.f32 1.0, %v2656_v45 }
 0xb24   : > { %v1260_v48 = vmul.f32 %v1259_v47, %v1252_v46 }
 0xb26   : > { %v1261_v49 = vpack.c.bf16 %v1260_v48, %v1260_v48 }
 0xb28   : > { %2497 = vmatmul.mubr.msk.bf16.vlgmr.msra.gmra.mrb[12].mxu1 %vm1301_vm5, %v1261_v49  ;;  %v2631_v49 = vld [vmem:[%s3245_s6 + $0x10] sm:$0xff]  }
 0xb29   : > { %2520 = vmatprep.mubr.msk.f32.mxu1 %vm2744_vm1, %v2743_v8 }
 0xbfb   : > { %v1339_v51 = vpop.f32.mrb[12].mxu1 }
 0xbfc   : > { %v1340_v52 = vadd.f32 %v2321_v50, %v1339_v51  ;;  %v2498_v53 = vpop.f32.mrb[13].mxu1  ;;  %v2632_v50 = vld [vmem:[%s3245_s6 + $0x18] sm:$0xff]  }
 0xbfd   : > { %v1342_v54 = vpop.f32.mrb[14].mxu1 }
 0xbfe   : > { %v2499_v55 = vpop.f32.mrb[15].mxu1  ;;  %v1345_v56 = vadd.f32 %v1340_v52, %v1184_v27 }
 0xc00   : > { %v1348_v57 = vsel %vm642_vm0, %v1345_v56, 0.0 }
 0xc01   : > { %1349 = vadd.xlane.f32.xlu0 %v1348_v57 }
 0xc8e   : > { %v1350_v58 = vpop.xlane.xlu0 %1349 }
 0xc8f   : > { %v1351_v59 = vmul.f32 0.03125, %v1350_v58  ;;  %v2349_v58 = vld [vmem:[%s3246_s7 + $0x1] ss:$0 sm:$0xff] }
 0xc91   : > { %v1352_v60 = vsub.f32 %v1345_v56, %v1351_v59 }
 0xc93   : > { %v1353_v61 = vmul.f32 %v1352_v60, %v1352_v60 }
 0xc95   : > { %v1354_v62 = vsel %vm642_vm0, %v1353_v61, 0.0 }
 0xc96   : > { %1355 = vadd.xlane.f32.xlu0 %v1354_v62 }
 0xd23   : > { %v1356_v1 = vpop.xlane.xlu0 %1355 }
 0xd24   : > { %v1357_v2 = vmul.f32 0.03125, %v1356_v1 }
 0xd26   : > { %v1358_v3 = vadd.f32 1e-12, %v1357_v2 }
 0xd28   : > { %2657 = vrsqrt.f32 %v1358_v3 }
 0xd32   : > { %v2658_v4 = vpop.eup %2657 }
 0xd33   : > { %v1360_v6 = vmul.f32 %v2658_v4, %v1352_v60 }
 0xd35   : > { %v1367_v9 = vmul.f32 %v2327_v5, %v1360_v6 }
 0xd37   : > { %v3058_v10 = vadd.f32 %v2328_v7, %v1367_v9  ;;  %v2633_v7 = vld [vmem:[%s3249_s10 + $0x10] sm:$0xff]   ;;  %v2634_v9 = vld [vmem:[%s3249_s10 + $0x18] sm:$0xff]  }
 0xd39   : > { %v1375_v11 = vpack.c.bf16 %v3058_v10, %v3058_v10 }
 0xd3b   : > { %2505 = vmatmul.mubr.msk.bf16.vlgmr.msra.gmra.mrb[12].mxu0 %vm642_vm0, %v1375_v11 }
 0xd3c   : > { %2510 = vmatprep.mubr.msk.f32.mxu0 %vm2744_vm1, %v2743_v8 }
 0xe0e   : > { %v1438_v13 = vpop.f32.mrb[12].mxu0 }
 0xe0f   : > { %v1439_v14 = vadd.f32 %v2334_v12, %v1438_v13  ;;  %v2506_v15 = vpop.f32.mrb[13].mxu0 }
 0xe10   : > { %v1441_v16 = vpop.f32.mrb[14].mxu0 }
 0xe11   : > { %1613 = vrot.lane.b32.xlu1 %v1439_v14, %s2747_s25  ;;  %1445 = vrot.lane.b32.xlu0 %v1439_v14, %s3289_s27  ;;  %v2507_v17 = vpop.f32.mrb[15].mxu0  ;;  %s3291_s25 = smov 48   ;;  %v2356_v16 = vld [vmem:[%s3248_s9 + $0x1] ss:$0 sm:$0xff] }
 0xe15   : > { %1611 = vrot.lane.b32.xlu0 %v1439_v14, %s3290_s0 }
 0xe83   : > { %v1614_v19 = vpop.permute.xlu1 %1613  ;;  %v1446_v18 = vpop.permute.xlu0 %1445 }
 0xe84   : > { %2509 = vmatpush3.xpose.msk.msra.mxu0 %vm742_vm2, %v1446_v18  ;;  %2519 = vmatpush3.xpose.msk.msra.mxu1 %vm742_vm2, %v1614_v19 }
 0xe85   : > { %2513 = vmatprep.subr.mxu0 %v2743_v8  ;;  %2528 = vmatprep.subr.bf16.mxu1 %v2743_v8 }
 0xe87   : > { %2511 = vmatmul.mubr.msk.f32.vlgmr.msra.gmra.mrb[6].mxu0 %vm742_vm2, %v1439_v14  ;;  %v1612_v20 = vpop.permute.xlu0 %1611 }
 0xe88   : > { %2521 = vmatmul.mubr.msk.f32.vlgmr.msra.gmra.mrb[6].mxu1 %vm742_vm2, %v1612_v20  ;;  %2515 = vmatprep.mubr.msk.f32.mxu0 %vm2744_vm1, %v2743_v8  ;;  %v2635_v20 = vld [vmem:[%s3251_s12 + $0x20] sm:$0xff]  }
 0xe89   : > { %2532 = vmatprep.mubr.msk.bf16.mxu1 %vm2744_vm1, %v2743_v8  ;;  %2529 = vmatpush3.bf16.msra.mxu1 %v2631_v49 }
 0xe8a   : > { %2530 = vmatprep.subr.bf16.mxu1 %v2743_v8 }
 0xe8d   : > { %2531 = vmatpush3.bf16.msra.mxu1 %v2632_v50 }
 0xe8e   : > { %2544 = vmatprep.subr.bf16.mxu1 %v2743_v8 }
 0xf5a   : > { %v1517_v21 = vpop.f32.mrb[6].mxu0 }
 0xf5b   : > { %v1521_v22 = vmul.f32 0.25, %v1517_v21  ;;  %v2512_v23 = vpop.f32.mrb[7].mxu0  ;;  %v1685_v24 = vpop.f32.mrb[6].mxu1  ;;  %v2636_v21 = vld [vmem:[%s3251_s12 + $0x28] sm:$0xff]  }
 0xf5c   : > { %v1689_v25 = vmul.f32 0.25, %v1685_v24  ;;  %v2522_v26 = vpop.f32.mrb[7].mxu1  ;;  %v2638_v23 = vld [vmem:[%s3251_s12 + $0x38] sm:$0xff]   ;;  %v2362_v24 = vld [vmem:[%s3250_s11 + $0x1] ss:$0 sm:$0xff] }
 0xf5d   : > { %v1522_v27 = vadd.f32 %v2958_v28, %v1521_v22  ;;  %v2637_v22 = vld [vmem:[%s3251_s12 + $0x30] sm:$0xff]  }
 0xf5e   : > { %v1690_v29 = vadd.f32 %v2958_v28, %v1689_v25 }
 0xf5f   : > { %v1523_v30 = vsel %vm825_vm3, %v1522_v27, -inf }
 0xf60   : > { %1524 = vmax.xlane.f32.xlu0 %v1523_v30  ;;  %v1691_v31 = vsel %vm825_vm3, %v1690_v29, -inf }
 0xf61   : > { %1692 = vmax.xlane.f32.xlu1 %v1691_v31 }
 0xf72   : > { %1702 = vrot.lane.b32.xlu1 %v1439_v14, %s3291_s25  ;;  %s629_s25 = sand.u32 1, %s2733_s22  }
 0xf73   : > { %s630_s26 = scalar_lea.vmem [#allocation3], %s629_s25  ;;  %s2217_s27 = scalar_lea.sflag [#allocation4], %s629_s25 }
 0xf74   : > { %s2229_s28 = sshll.u32 %s630_s26, 4  ;;  %s3198_s28 = int_to_ptr.vmem [resolvable:$true] %s2229_s28 }
 0xf75   : > { %s2679_s0 = scalar_lea.vmem %s3198_s28, 16 }
 0xf76   : > { %p2680_p11 = scmp.ne.s32.totalorder %s3198_s28, %s2679_s0 }
 0xf78   : > { %p2681_p12 = pnand %p2680_p11, %p2895_p5 }
 0xf7a   : > { %p2682_p13 = pneg %p2681_p12 }
 0xfed   : > { %v1525_v32 = vpop.xlane.xlu0 %1524 }
 0xfee   : > { %v1526_v33 = vsub.f32 %v1522_v27, %v1525_v32  ;;  %v1693_v34 = vpop.xlane.xlu1 %1692 }
 0xfef   : > { %v1694_v35 = vsub.f32 %v1690_v29, %v1693_v34 }
 0xff0   : > { %v1527_v36 = vmul.f32 1.442695, %v1526_v33 }
 0xff1   : > { %v1695_v37 = vmul.f32 1.442695, %v1694_v35 }
 0xff2   : > { %2659 = vpow2.f32 %v1527_v36  ;;  %v1703_v46 = vpop.permute.xlu1 %1702 }
 0xff3   : > { %2661 = vpow2.f32 %v1695_v37 }
 0xffc   : > { %v2660_v38 = vpop.eup %2659 }
 0xffd   : > { %v1529_v39 = vsel %vm825_vm3, %v2660_v38, 0.0  ;;  %v2662_v28 = vpop.eup %2661 }
 0xffe   : > { %1530 = vadd.xlane.f32.xlu0 %v1529_v39  ;;  %v1697_v40 = vsel %vm825_vm3, %v2662_v28, 0.0 }
0x1002   : > { %1698 = vadd.xlane.f32.xlu0 %v1697_v40  ;;  %v2375_v40 = vld [vmem:[%s3252_s13 + $0x1] ss:$0 sm:$0xff] }
0x1018   : > { %1534 = vrot.lane.b32.xlu0 %v1439_v14, %s3292_s29  ;;  %v2355_v14 = vld [vmem:[%s3247_s8 + $0x1] ss:$0 sm:$0xff]  ;;  %s2391_s29 = sshll.u32 %s2878_s2, 4  ;;  %s2751_s2 = smov [#allocation3]  }
0x1019   : > { %s2683_s3 = sshll.u32 %s2751_s2, 4  ;;  %s2684_s3 = int_to_ptr.vmem [resolvable:$false] %s2683_s3 }
0x101a   : > { %s2685_s5 = scalar_lea.vmem %s2684_s3, 32  ;;  %p2686_p0 = scmp.lt.s32.totalorder %s3198_s28, %s2684_s3 }
0x101b   : > { %p2687_p1 = scmp.lt.s32.totalorder %s2685_s5, %s2679_s0 }
0x101d   : > { %p2688_p2 = por %p2687_p1, %p2686_p0 }
0x101f   : > { %p2689_p3 = pnand %p2688_p2, %p2682_p13 }
0x108b   : > { %v1531_v41 = vpop.xlane.xlu0 %1530 }
0x108c   : > { %2663 = vrcp.f32 %v1531_v41 }
0x108f   : > { %v1699_v42 = vpop.xlane.xlu0 %1698 }
0x1090   : > { %2665 = vrcp.f32 %v1699_v42 }
0x1093   : > { %v1535_v43 = vpop.permute.xlu0 %1534 }
0x1094   : > { %2514 = vmatpush3.msra.mxu0 %v1535_v43 }
0x1095   : > { %2523 = vmatprep.subr.mxu0 %v2743_v8 }
0x1096   : > { %v2664_v44 = vpop.eup %2663 }
0x1097   : > { %v1533_v45 = vmul.f32 %v2664_v44, %v2660_v38 }
0x1099   : > { %2516 = vmatmul.mubr.msk.f32.vlgmr.msra.gmra.mrb[16].mxu0 %vm825_vm3, %v1533_v45 }
0x109a   : > { %v2666_v47 = vpop.eup %2665  ;;  %2524 = vmatpush3.msra.mxu0 %v1703_v46  ;;  %2525 = vmatprep.mubr.msk.f32.mxu0 %vm2744_vm1, %v2743_v8 }
0x109b   : > { %v1701_v48 = vmul.f32 %v2666_v47, %v2662_v28  ;;  %2536 = vmatprep.subr.bf16.mxu0 %v2743_v8 }
0x109d   : > { %2526 = vmatmul.mubr.msk.f32.vlgmr.msra.gmra.mrb[18].mxu0 %vm825_vm3, %v1701_v48 }
0x109e   : > { %2540 = vmatprep.mubr.msk.bf16.mxu0 %vm2744_vm1, %v2743_v8  ;;  %2537 = vmatpush3.bf16.msra.mxu0 %v2633_v7 }
0x109f   : > { %2538 = vmatprep.subr.bf16.mxu0 %v2743_v8 }
0x10a2   : > { %2539 = vmatpush3.bf16.msra.mxu0 %v2634_v9 }
0x10a3   : > { %2556 = vmatprep.subr.bf16.mxu0 %v2743_v8 }
0x116c   : > { %v1606_v51 = vpop.f32.mrb[16].mxu0 }
0x116d   : > { %1610 = vst.msk [vmem:[#allocation2] sm:$0xff] %vm742_vm2, %v1606_v51  ;;  %v2517_v52 = vpop.f32.mrb[17].mxu0 }
0x1170   : > { %v1774_v53 = vpop.f32.mrb[18].mxu0 }
0x1171   : > { %1779 = vrot.lane.b32.xlu1 %v1774_v53, %s3293_s21  ;;  %v2527_v54 = vpop.f32.mrb[19].mxu0  ;;  %v2639_v53 = vld [vmem:[%s3255_s16] sm:$0xff]   ;;  %s3196_s21 = scalar_lea.hbm %s3259_s20, %s2391_s29 }
0x1172   : > { %v2640_v54 = vld [vmem:[%s3255_s16 + $0x8] sm:$0xff]  }
0x11e3   : > { %v1780_v55 = vpop.permute.xlu1 %1779 }
0x11e4   : > { %1782 = vst.msk [vmem:[#allocation2] sm:$0xff] %vm1085_vm4, %v1780_v55 }
0x11eb   : > { %v1783_v56 = vld [vmem:[#allocation2] sm:$0xff] }
0x11ec   : > { %v1784_v57 = vpack.c.bf16 %v1783_v56, %v1783_v56 }
0x11ee   : > { %2533 = vmatmul.mubr.msk.bf16.vlgmr.msra.gmra.mrb[16].mxu1 %vm642_vm0, %v1784_v57 }
0x11ef   : > { %2552 = vmatprep.mubr.msk.bf16.mxu1 %vm2744_vm1, %v2743_v8  ;;  %2545 = vmatpush3.bf16.msra.mxu1 %v2635_v20 }
0x11f0   : > { %2546 = vmatprep.subr.bf16.mxu1 %v2743_v8 }
0x11f3   : > { %2547 = vmatpush3.bf16.msra.mxu1 %v2636_v21 }
0x11f4   : > { %2548 = vmatprep.subr.bf16.mxu1 %v2743_v8 }
0x11f7   : > { %2549 = vmatpush3.bf16.msra.mxu1 %v2637_v22 }
0x11f8   : > { %2550 = vmatprep.subr.bf16.mxu1 %v2743_v8 }
0x11fb   : > { %2551 = vmatpush3.bf16.msra.mxu1 %v2638_v23 }
0x12c1   : > { %v1847_v59 = vpop.f32.mrb[16].mxu1 }
0x12c2   : > { %v1848_v60 = vadd.f32 %v2349_v58, %v1847_v59  ;;  %v2534_v61 = vpop.f32.mrb[17].mxu1  ;;  %v2383_v59 = vld [vmem:[%s3253_s14 + $0x1] ss:$0 sm:$0xff] }
0x12c3   : > { %v1850_v62 = vpop.f32.mrb[18].mxu1  ;;  %v2384_v61 = vld [vmem:[%s3254_s15 + $0x1] ss:$0 sm:$0xff] }
0x12c4   : > { %v2535_v63 = vpop.f32.mrb[19].mxu1  ;;  %v1853_v0 = vadd.f32 %v1848_v60, %v3058_v10 }
0x12c6   : > { %v1858_v1 = vsel %vm642_vm0, %v1853_v0, 0.0 }
0x12c7   : > { %1859 = vadd.xlane.f32.xlu0 %v1858_v1  ;;  %v2641_v1 = vld [vmem:[%s3257_s18] sm:$0xff]  }
0x1354   : > { %v1860_v2 = vpop.xlane.xlu0 %1859 }
0x1355   : > { %v1861_v3 = vmul.f32 0.03125, %v1860_v2  ;;  %v2642_v2 = vld [vmem:[%s3257_s18 + $0x8] sm:$0xff]  }
0x1357   : > { %v1862_v4 = vsub.f32 %v1853_v0, %v1861_v3  ;;  %v2085_v3 = vld [vmem:[%s3256_s17] sm:$0x1] }
0x1359   : > { %v1863_v5 = vmul.f32 %v1862_v4, %v1862_v4 }
0x135b   : > { %v1864_v6 = vsel %vm642_vm0, %v1863_v5, 0.0 }
0x135c   : > { %1865 = vadd.xlane.f32.xlu1 %v1864_v6 }
0x13e9   : > { %v1866_v10 = vpop.xlane.xlu1 %1865 }
0x13ea   : > { %v1867_v11 = vmul.f32 0.03125, %v1866_v10 }
0x13ec   : > { %v1868_v12 = vadd.f32 1e-12, %v1867_v11 }
0x13ee   : > { %2667 = vrsqrt.f32 %v1868_v12 }
0x13f8   : > { %v2668_v13 = vpop.eup %2667 }
0x13f9   : > { %v1870_v15 = vmul.f32 %v2668_v13, %v1862_v4 }
0x13fb   : > { %v1877_v17 = vmul.f32 %v2355_v14, %v1870_v15 }
0x13fd   : > { %v1884_v19 = vadd.f32 %v2356_v16, %v1877_v17 }
0x13ff   : > { %v1885_v18 = vpack.c.bf16 %v1884_v19, %v1884_v19 }
0x1401   : > { %2541 = vmatmul.mubr.msk.bf16.vlgmr.msra.gmra.mrb[20].mxu0 %vm642_vm0, %v1885_v18 }
0x1402   : > { %2560 = vmatprep.mubr.msk.bf16.mxu0 %vm2744_vm1, %v2743_v8  ;;  %2557 = vmatpush3.bf16.msra.mxu0 %v2639_v53 }
0x1403   : > { %2558 = vmatprep.subr.bf16.mxu0 %v2743_v8 }
0x1406   : > { %2559 = vmatpush3.bf16.msra.mxu0 %v2640_v54 }
0x1407   : > { %2564 = vmatprep.subr.bf16.mxu0 %v2743_v8 }
0x14d4   : > { %v1948_v25 = vpop.f32.mrb[20].mxu0 }
0x14d5   : > { %v1949_v26 = vadd.f32 %v2362_v24, %v1948_v25  ;;  %v2542_v27 = vpop.f32.mrb[21].mxu0 }
0x14d6   : > { %v1951_v29 = vpop.f32.mrb[22].mxu0 }
0x14d7   : > { %v1955_v30 = vmul.f32 0.044715, %v1949_v26  ;;  %v2543_v31 = vpop.f32.mrb[23].mxu0  ;;  %v1954_v37 = vmul.f32 0.5, %v1949_v26 }
0x14d9   : > { %v1956_v32 = vmul.f32 %v1955_v30, %v1949_v26 }
0x14db   : > { %v1957_v33 = vmul.f32 %v1956_v32, %v1949_v26 }
0x14dd   : > { %v1958_v34 = vadd.f32 %v1957_v33, %v1949_v26 }
0x14df   : > { %v1959_v35 = vmul.f32 0.7978846, %v1958_v34 }
0x14e1   : > { %2669 = vtanh.f32 %v1959_v35 }
0x14eb   : > { %v2670_v36 = vpop.eup %2669 }
0x14ec   : > { %v1961_v38 = vadd.f32 1.0, %v2670_v36 }
0x14ee   : > { %v1962_v39 = vmul.f32 %v1961_v38, %v1954_v37 }
0x14f0   : > { %v1963_v28 = vpack.c.bf16 %v1962_v39, %v1962_v39 }
0x14f2   : > { %2553 = vmatmul.mubr.msk.bf16.vlgmr.msra.gmra.mrb[20].mxu1 %vm1301_vm5, %v1963_v28 }
0x15c5   : > { %v2042_v41 = vpop.f32.mrb[20].mxu1 }
0x15c6   : > { %v2043_v42 = vadd.f32 %v2375_v40, %v2042_v41  ;;  %v2554_v43 = vpop.f32.mrb[21].mxu1 }
0x15c7   : > { %v2045_v44 = vpop.f32.mrb[22].mxu1 }
0x15c8   : > { %v2555_v45 = vpop.f32.mrb[23].mxu1  ;;  %v2048_v46 = vadd.f32 %v2043_v42, %v1884_v19 }
0x15ca   : > { %v2053_v47 = vsel %vm642_vm0, %v2048_v46, 0.0 }
0x15cb   : > { %2054 = vadd.xlane.f32.xlu0 %v2053_v47 }
0x1658   : > { %v2055_v48 = vpop.xlane.xlu0 %2054 }
0x1659   : > { %v2056_v49 = vmul.f32 0.03125, %v2055_v48 }
0x165b   : > { %v2057_v50 = vsub.f32 %v2048_v46, %v2056_v49 }
0x165d   : > { %v2058_v51 = vmul.f32 %v2057_v50, %v2057_v50 }
0x165f   : > { %v2059_v52 = vsel %vm642_vm0, %v2058_v51, 0.0 }
0x1660   : > { %2060 = vadd.xlane.f32.xlu0 %v2059_v52 }
0x16ed   : > { %v2061_v55 = vpop.xlane.xlu0 %2060 }
0x16ee   : > { %v2062_v56 = vmul.f32 0.03125, %v2061_v55 }
0x16f0   : > { %v2063_v57 = vadd.f32 1e-12, %v2062_v56 }
0x16f2   : > { %2671 = vrsqrt.f32 %v2063_v57 }
0x16fc   : > { %v2672_v58 = vpop.eup %2671 }
0x16fd   : > { %v2065_v60 = vmul.f32 %v2672_v58, %v2057_v50 }
0x16ff   : > { %v2072_v62 = vmul.f32 %v2383_v59, %v2065_v60 }
0x1701   : > { %v2079_v63 = vadd.f32 %v2384_v61, %v2072_v62 }
0x1703   : > { %v2080_v0 = vpack.c.bf16 %v2079_v63, %v2079_v63 }
0x1705   : > { %2561 = vmatmul.mubr.msk.bf16.vlgmr.msra.gmra.mrb[24].mxu0 %vm642_vm0, %v2080_v0 }
0x1706   : > { %2568 = vmatprep.mubr.msk.bf16.mxu0 %vm2744_vm1, %v2743_v8  ;;  %2565 = vmatpush3.bf16.msra.mxu0 %v2641_v1 }
0x1707   : > { %2566 = vmatprep.subr.bf16.mxu0 %v2743_v8  ;;  %v2147_v8 = vld [vmem:[%s3258_s19] sm:$0x1] }
0x170a   : > { %2567 = vmatpush3.bf16.msra.mxu0 %v2642_v2 }
0x17d8   : > { %v2135_v4 = vpop.f32.mrb[24].mxu0 }
0x17d9   : > { %v2136_v5 = vadd.f32 %v2135_v4, %v2085_v3  ;;  %v2562_v6 = vpop.f32.mrb[25].mxu0 }
0x17da   : > { %v2138_v7 = vpop.f32.mrb[26].mxu0 }
0x17db   : > { %2673 = vtanh.f32 %v2136_v5  ;;  %v2563_v9 = vpop.f32.mrb[27].mxu0 }
0x17e5   : > { %v2674_v10 = vpop.eup %2673 }
0x17e6   : > { %v2142_v11 = vpack.c.bf16 %v2674_v10, %v2674_v10 }
0x17e8   : > { %2569 = vmatmul.mubr.msk.bf16.vlgmr.msra.gmra.mrb[28].mxu0 %vm642_vm0, %v2142_v11 }
0x18bb   : > { %v2197_v12 = vpop.f32.mrb[28].mxu0 }
0x18bc   : > { %v2198_v13 = vadd.f32 %v2197_v12, %v2147_v8  ;;  %v2570_v14 = vpop.f32.mrb[29].mxu0 }
0x18bd   : > { %v2200_v15 = vpop.f32.mrb[30].mxu0 }
0x18be   : > { %v2571_v16 = vpop.f32.mrb[31].mxu0  ;;  %v2204_v17 = vsel %vm2203_vm6, %v2198_v13, -inf }
0x18bf   : > { %2205 = vmax.xlane.f32.xlu0 %v2204_v17 }
0x194c   : > { %v2206_v19 = vpop.xlane.xlu0 %2205 }
0x194d   : > { %v2207_v18 = vsub.f32 %v2198_v13, %v2206_v19 }
0x194f   : > { %v2208_v20 = vmul.f32 1.442695, %v2207_v18 }
0x1951   : > { %2675 = vpow2.f32 %v2208_v20 }
0x195b   : > { %v2676_v21 = vpop.eup %2675 }
0x195c   : > { %v2210_v22 = vsel %vm2203_vm6, %v2676_v21, 0.0 }
0x195d   : > { %2211 = vadd.xlane.f32.xlu1 %v2210_v22 }
0x19ea   : > { %v2212_v23 = vpop.xlane.xlu1 %2211 }
0x19eb   : > { %2677 = vrcp.f32 %v2212_v23 }
0x19f5   : > { %v2678_v24 = vpop.eup %2677 }
0x19f6   : > { %v2214_v25 = vmul.f32 %v2678_v24, %v2676_v21 }
0x19f8   : > { %2215 = vst.msk [vmem:[%s630_s26] sm:$0x1] %vm2203_vm6, %v2214_v25 }
0x19f9   : > { %2692 = shalt.err (!%p2689_p3)
}
0x19fa   : > { %s2693_s25 = scalar_lea.hbm %s3196_s21, 16  ;;  %s2697_s30 = scalar_lea.hbm %s3259_s20, 32 }
0x19fb   : > { %p2694_p4 = scmp.ne.s32.totalorder %s3196_s21, %s2693_s25  ;;  %p2698_p9 = scmp.lt.u32.totalorder %s3196_s21, %s3259_s20 }
0x19fc   : > { %p2699_p10 = scmp.lt.u32.totalorder %s2697_s30, %s2693_s25  ;;  %p2701_p12 = scmp.lt.u32.totalorder %s2693_s25, %s3196_s21 }
0x19fd   : > { %p2695_p7 = pnand %p2694_p4, %p2895_p5 }
0x19fe   : > { %p2700_p11 = por %p2699_p10, %p2698_p9 }
0x19ff   : > { %p2696_p8 = pneg %p2695_p7 }
0x1a00   : > { %p2702_p13 = por %p2701_p12, %p2700_p11 }
0x1a02   : > { %p2703_p0 = pnand %p2702_p13, %p2696_p8 }
0x1a04   : > { %2706 = shalt.err (!%p2703_p0)
}
0x1a05   : > { %2572 = dma.vmem_to_hbm [thread:$0]  (%p2895_p5), %s3198_s28, 16, %s3196_s21, %s2217_s27  }
0x1a06 PF: > { %p2578_p1 = scmp.ge.s32.totalorder %s2741_s24, 2  ;;  %s2241_s0 = sand.u32 1, %s2729_s1  }
0x1a07   : > { %s2242_s2 = scalar_lea.sflag [#allocation4], %s2241_s0 }
0x1a08   : > { %p2575_p2 = pnand %p2578_p1, %p2899_p6 }
0x1a0a   : > { %2724 = dma.done.wait (!%p2575_p2), %s2242_s2, 16  }
0x1a0b   : > { %2726 = vsyncadd (!%p2575_p2), %s2242_s2, 4294967280  ;;  %s3295_s24 = sld [smem:[#allocation7_spill]]  ;;  %s3296_s25 = sld [smem:[#allocation6_spill]] }
0x1a0c   : > { %s3297_s23 = sld [smem:[#allocation8_spill]]  ;;  %s3298_s1 = smov %s2733_s22 }
0x1a11   : > { %p30_p3 = scmp.ge.s32.totalorder %s3295_s24, 4   ;;  %s3299_s22 = smov %s3296_s25 }
0x1a13   :  { %32 = sbr.rel (!%p30_p3) target bundleno = 10 (0xa), region = 150 }
0x1a1a   :  { %2246 = vsyncpa [#allocation4], 1 }
0x1a1b   :  { %2248 = vsyncpa [#allocation4 + $0x1], 1 }

</bundles_post_ra>
